<compile_context>
chip_gen: v7x
topology: tpu7x:2x2x1
jax: 0.10.0
libtpu: 0.0.40
codegen_flags: <defaults>
</compile_context>

<pallas_src>
import functools
import math

import jax
import jax.numpy as jnp
from jax.experimental import pallas as pl
from jax.experimental.pallas import tpu as pltpu


# ----------------------------------------------------------------------------
# Small helpers
# ----------------------------------------------------------------------------

def _row_tile(m, target=256):
    """Largest row tile <= target that divides m (multiple of 8), else m."""
    if m <= target:
        return m
    t = (target // 8) * 8
    while t >= 8:
        if m % t == 0:
            return t
        t -= 8
    return m


def _heads_per_block(h, dk):
    """Heads per attention grid step.

    Prefer the smallest G with (G*dk) % 128 == 0 (lane-dense blocks, legal
    BlockSpec); otherwise fall back to all heads so the block spans the full
    feature dim (always legal)."""
    for g in range(1, h + 1):
        if h % g == 0 and (g * dk) % 128 == 0:
            return g
    return h


def _layer_norm(x, a, b, eps):
    """PyTorch-reference LayerNorm: unbiased std, eps added to std."""
    d = x.shape[-1]
    mean = jnp.mean(x, axis=-1, keepdims=True)
    diff = x - mean
    var = jnp.sum(diff * diff, axis=-1, keepdims=True) * (1.0 / (d - 1))
    std = jnp.sqrt(var)
    return a * diff * pl.reciprocal(std + eps, approx=True) + b


# ----------------------------------------------------------------------------
# Kernels
# ----------------------------------------------------------------------------

def _layernorm_kernel(x_ref, a_ref, b_ref, o_ref, *, eps):
    o_ref[...] = _layer_norm(x_ref[...], a_ref[...], b_ref[...], eps).astype(o_ref.dtype)


def _ln_linear_kernel(x_ref, a_ref, b_ref, w_ref, bias_ref, o_ref, *, eps):
    # y = LN(x) @ W + bias   (LN fused into the projection prologue)
    xn = _layer_norm(x_ref[...], a_ref[...], b_ref[...], eps)
    y = jnp.dot(xn.astype(w_ref.dtype), w_ref[...],
                preferred_element_type=jnp.float32) + bias_ref[...]
    o_ref[...] = y.astype(o_ref.dtype)


def _linear_kernel(x_ref, w_ref, b_ref, o_ref):
    y = jnp.dot(x_ref[...].astype(w_ref.dtype), w_ref[...],
                preferred_element_type=jnp.float32) + b_ref[...]
    o_ref[...] = y.astype(o_ref.dtype)


def _linear_res_kernel(x_ref, res_ref, w_ref, b_ref, o_ref):
    # y = residual + x @ W + bias   (residual add fused into the output proj)
    y = jnp.dot(x_ref[...].astype(w_ref.dtype), w_ref[...],
                preferred_element_type=jnp.float32) + b_ref[...]
    o_ref[...] = (res_ref[...] + y).astype(o_ref.dtype)


def _ln_ffn_res_kernel(x_ref, a_ref, b_ref, w1_ref, b1_ref, w2_ref, b2_ref,
                       o_ref, *, eps):
    # y = x + w2(relu(w1(LN(x)) + b1)) + b2   — entire FFN sublayer fused
    x = x_ref[...]
    xn = _layer_norm(x, a_ref[...], b_ref[...], eps)
    h = jnp.dot(xn.astype(w1_ref.dtype), w1_ref[...],
                preferred_element_type=jnp.float32) + b1_ref[...]
    h = jnp.maximum(h, 0.0)
    y = jnp.dot(h.astype(w2_ref.dtype), w2_ref[...],
                preferred_element_type=jnp.float32) + b2_ref[...]
    o_ref[...] = (x + y).astype(o_ref.dtype)


def _attn_kernel(q_ref, k_ref, v_ref, m_ref, o_ref, *, scale, heads):
    # q_ref: (1, Tq, G*dk), k_ref/v_ref: (1, Tk, G*dk), m_ref: (1, mq, Tk) int8
    q = q_ref[0]
    k = k_ref[0]
    v = v_ref[0]
    mask_f = m_ref[0].astype(jnp.float32)           # 1.0 keep / 0.0 mask out
    gdk = q.shape[-1]
    dk = gdk // heads
    neg = jnp.float32(-1e9)
    outs = []
    for g in range(heads):                           # unrolled: static constant
        lo, hi = g * dk, (g + 1) * dk
        qg = q[:, lo:hi]
        kg = k[:, lo:hi]
        vg = v[:, lo:hi]
        s = jnp.dot(qg, kg.T, preferred_element_type=jnp.float32) * scale
        s = jnp.where(mask_f == 0.0, neg, s)
        s = s - jnp.max(s, axis=-1, keepdims=True)
        p = jnp.exp(s)
        p = p * pl.reciprocal(jnp.sum(p, axis=-1, keepdims=True), approx=True)
        outs.append(jnp.dot(p.astype(vg.dtype), vg,
                            preferred_element_type=jnp.float32))
    o_ref[0] = jnp.concatenate(outs, axis=-1).astype(o_ref.dtype)


# ----------------------------------------------------------------------------
# pallas_call wrappers (row-tiled, weights resident, "parallel" semantics)
# ----------------------------------------------------------------------------

_PAR1 = pltpu.CompilerParams(dimension_semantics=("parallel",))
_PAR2 = pltpu.CompilerParams(dimension_semantics=("parallel", "parallel"))


def layernorm(x2d, a, b, *, eps=1e-6, row_tile=1024):
    m, d = x2d.shape
    tm = _row_tile(m, row_tile)
    return pl.pallas_call(
        functools.partial(_layernorm_kernel, eps=eps),
        out_shape=jax.ShapeDtypeStruct((m, d), x2d.dtype),
        grid=(m // tm,),
        in_specs=[
            pl.BlockSpec((tm, d), lambda i: (i, 0)),
            pl.BlockSpec((1, d), lambda i: (0, 0)),
            pl.BlockSpec((1, d), lambda i: (0, 0)),
        ],
        out_specs=pl.BlockSpec((tm, d), lambda i: (i, 0)),
        compiler_params=_PAR1,
    )(x2d, a, b)


def ln_linear(x2d, a, b, w, bias, *, eps=1e-6, row_tile=256):
    m, d = x2d.shape
    dout = w.shape[1]
    tm = _row_tile(m, row_tile)
    return pl.pallas_call(
        functools.partial(_ln_linear_kernel, eps=eps),
        out_shape=jax.ShapeDtypeStruct((m, dout), x2d.dtype),
        grid=(m // tm,),
        in_specs=[
            pl.BlockSpec((tm, d), lambda i: (i, 0)),
            pl.BlockSpec((1, d), lambda i: (0, 0)),
            pl.BlockSpec((1, d), lambda i: (0, 0)),
            pl.BlockSpec((d, dout), lambda i: (0, 0)),     # weight stays resident
            pl.BlockSpec((1, dout), lambda i: (0, 0)),
        ],
        out_specs=pl.BlockSpec((tm, dout), lambda i: (i, 0)),
        compiler_params=_PAR1,
    )(x2d, a, b, w, bias)


def linear(x2d, w, bias, *, row_tile=256):
    m, d = x2d.shape
    dout = w.shape[1]
    tm = _row_tile(m, row_tile)
    return pl.pallas_call(
        _linear_kernel,
        out_shape=jax.ShapeDtypeStruct((m, dout), x2d.dtype),
        grid=(m // tm,),
        in_specs=[
            pl.BlockSpec((tm, d), lambda i: (i, 0)),
            pl.BlockSpec((d, dout), lambda i: (0, 0)),
            pl.BlockSpec((1, dout), lambda i: (0, 0)),
        ],
        out_specs=pl.BlockSpec((tm, dout), lambda i: (i, 0)),
        compiler_params=_PAR1,
    )(x2d, w, bias)


def linear_residual(x2d, res2d, w, bias, *, row_tile=256):
    m, d = x2d.shape
    dout = w.shape[1]
    tm = _row_tile(m, row_tile)
    return pl.pallas_call(
        _linear_res_kernel,
        out_shape=jax.ShapeDtypeStruct((m, dout), res2d.dtype),
        grid=(m // tm,),
        in_specs=[
            pl.BlockSpec((tm, d), lambda i: (i, 0)),
            pl.BlockSpec((tm, dout), lambda i: (i, 0)),
            pl.BlockSpec((d, dout), lambda i: (0, 0)),
            pl.BlockSpec((1, dout), lambda i: (0, 0)),
        ],
        out_specs=pl.BlockSpec((tm, dout), lambda i: (i, 0)),
        compiler_params=_PAR1,
    )(x2d, res2d, w, bias)


def ln_ffn_residual(x2d, a, b, w1, b1, w2, b2, *, eps=1e-6, row_tile=256):
    m, d = x2d.shape
    dff = w1.shape[1]
    tm = _row_tile(m, row_tile)
    return pl.pallas_call(
        functools.partial(_ln_ffn_res_kernel, eps=eps),
        out_shape=jax.ShapeDtypeStruct((m, d), x2d.dtype),
        grid=(m // tm,),
        in_specs=[
            pl.BlockSpec((tm, d), lambda i: (i, 0)),
            pl.BlockSpec((1, d), lambda i: (0, 0)),
            pl.BlockSpec((1, d), lambda i: (0, 0)),
            pl.BlockSpec((d, dff), lambda i: (0, 0)),
            pl.BlockSpec((1, dff), lambda i: (0, 0)),
            pl.BlockSpec((dff, d), lambda i: (0, 0)),
            pl.BlockSpec((1, d), lambda i: (0, 0)),
        ],
        out_specs=pl.BlockSpec((tm, d), lambda i: (i, 0)),
        compiler_params=_PAR1,
    )(x2d, a, b, w1, b1, w2, b2)


def mha_attention(q, k, v, mask, *, h):
    """q: (B, Tq, D), k/v: (B, Tk, D), mask: (B, 1|Tq, Tk) int8 -> (B, Tq, D).

    Grid = (batch, head-group).  Heads are sliced from the feature axis by the
    index_map; the per-batch mask is reused across heads (never broadcast)."""
    b, tq, d = q.shape
    tk = k.shape[1]
    dk = d // h
    g = _heads_per_block(h, dk)
    hg = h // g
    gdk = g * dk
    mq = mask.shape[1]
    scale = 1.0 / math.sqrt(dk)
    return pl.pallas_call(
        functools.partial(_attn_kernel, scale=scale, heads=g),
        out_shape=jax.ShapeDtypeStruct((b, tq, d), q.dtype),
        grid=(b, hg),
        in_specs=[
            pl.BlockSpec((1, tq, gdk), lambda bi, gi: (bi, 0, gi)),
            pl.BlockSpec((1, tk, gdk), lambda bi, gi: (bi, 0, gi)),
            pl.BlockSpec((1, tk, gdk), lambda bi, gi: (bi, 0, gi)),
            pl.BlockSpec((1, mq, tk), lambda bi, gi: (bi, 0, 0)),
        ],
        out_specs=pl.BlockSpec((1, tq, gdk), lambda bi, gi: (bi, 0, gi)),
        compiler_params=_PAR2,
    )(q, k, v, mask)


# ----------------------------------------------------------------------------
# Decoder forward (parameter plumbing; reshapes are layout no-ops)
# ----------------------------------------------------------------------------

def decoder_forward(params, x, memory, src_mask, tgt_mask, h):
    bsz, t, d = x.shape
    s = memory.shape[1]
    x2 = x.reshape(bsz * t, d)
    mem2 = memory.reshape(bsz * s, d)

    for lp in params["layers"]:
        # ---- sublayer 0: pre-norm self-attention + residual ---------------
        sa = lp["self_attn"]
        qkv = ln_linear(x2, lp["ln0_a"], lp["ln0_b"], sa["wqkv"], sa["bqkv"])
        q, k, v = jnp.split(qkv.reshape(bsz, t, 3 * d), 3, axis=-1)
        o = mha_attention(q, k, v, tgt_mask, h=h)
        x2 = linear_residual(o.reshape(bsz * t, d), x2, sa["wo"], sa["bo"])

        # ---- sublayer 1: pre-norm source-attention + residual -------------
        ca = lp["src_attn"]
        q = ln_linear(x2, lp["ln1_a"], lp["ln1_b"], ca["wq"], ca["bq"])
        q = q.reshape(bsz, t, d)
        kv = linear(mem2, ca["wkv"], ca["bkv"]).reshape(bsz, s, 2 * d)
        k, v = jnp.split(kv, 2, axis=-1)
        o = mha_attention(q, k, v, src_mask, h=h)
        x2 = linear_residual(o.reshape(bsz * t, d), x2, ca["wo"], ca["bo"])

        # ---- sublayer 2: pre-norm feed-forward + residual (fully fused) ---
        x2 = ln_ffn_residual(x2, lp["ln2_a"], lp["ln2_b"],
                             lp["w1"], lp["b1"], lp["w2"], lp["b2"])

    # final Decoder.norm
    return layernorm(x2, params["norm_a"], params["norm_b"]).reshape(bsz, t, d)


# ----------------------------------------------------------------------------
# Parameters
# ----------------------------------------------------------------------------

def init_params(key, n_layers, d_model, d_ff, dtype=jnp.float32):
    # dtype=jnp.bfloat16 gives the bf16 MXU path (f32 accumulation is kept and
    # LayerNorm/softmax statistics stay f32).  Default f32 matches the spec.
    def dense(k, shape):
        return (0.02 * jax.random.normal(k, shape)).astype(dtype)

    def zeros(shape):
        return jnp.zeros(shape, dtype)

    def self_attn_params(k):
        kq, kk, kv, ko = jax.random.split(k, 4)
        wqkv = jnp.concatenate(
            [dense(kq, (d_model, d_model)),
             dense(kk, (d_model, d_model)),
             dense(kv, (d_model, d_model))], axis=1)
        return {"wqkv": wqkv, "bqkv": zeros((1, 3 * d_model)),
                "wo": dense(ko, (d_model, d_model)), "bo": zeros((1, d_model))}

    def src_attn_params(k):
        kq, kk, kv, ko = jax.random.split(k, 4)
        wkv = jnp.concatenate(
            [dense(kk, (d_model, d_model)),
             dense(kv, (d_model, d_model))], axis=1)
        return {"wq": dense(kq, (d_model, d_model)), "bq": zeros((1, d_model)),
                "wkv": wkv, "bkv": zeros((1, 2 * d_model)),
                "wo": dense(ko, (d_model, d_model)), "bo": zeros((1, d_model))}

    ones_f = lambda shp: jnp.ones(shp, jnp.float32)
    zeros_f = lambda shp: jnp.zeros(shp, jnp.float32)

    layers = []
    for lk in jax.random.split(key, n_layers):
        k_sa, k_ca, k_f1, k_f2 = jax.random.split(lk, 4)
        layers.append({
            "self_attn": self_attn_params(k_sa),
            "src_attn": src_attn_params(k_ca),
            "w1": dense(k_f1, (d_model, d_ff)), "b1": zeros((1, d_ff)),
            "w2": dense(k_f2, (d_ff, d_model)), "b2": zeros((1, d_model)),
            "ln0_a": ones_f((1, d_model)), "ln0_b": zeros_f((1, d_model)),
            "ln1_a": ones_f((1, d_model)), "ln1_b": zeros_f((1, d_model)),
            "ln2_a": ones_f((1, d_model)), "ln2_b": zeros_f((1, d_model)),
        })
    return {
        "layers": layers,
        "norm_a": ones_f((1, d_model)),
        "norm_b": zeros_f((1, d_model)),
    }


# ----------------------------------------------------------------------------
# Demo
# ----------------------------------------------------------------------------

if __name__ == "__main__":
    B, T, S, D, H, DFF, N = 2, 8, 8, 32, 4, 64, 2

    key = jax.random.PRNGKey(0)
    k_p, k_x, k_m = jax.random.split(key, 3)

    params = init_params(k_p, N, D, DFF)
    x = jax.random.normal(k_x, (B, T, D), dtype=jnp.float32)
    memory = jax.random.normal(k_m, (B, S, D), dtype=jnp.float32)

    # tgt_mask: causal (B, T, T); src_mask: all-ones (B, 1, S).  int8 (not f32)
    # and never broadcast over heads — the kernel index_map reuses them.
    tgt_mask = jnp.broadcast_to(
        jnp.tril(jnp.ones((T, T), jnp.int8))[None], (B, T, T))
    src_mask = jnp.ones((B, 1, S), jnp.int8)

    fwd = jax.jit(functools.partial(decoder_forward, h=H))
    out = fwd(params, x, memory, src_mask, tgt_mask)
    jax.block_until_ready(out)

    assert out.shape == (B, T, D) and out.dtype == jnp.float32
    print("KERNEL_OK")
</pallas_src>

<mosaic_0001>
module attributes {stable_mosaic.version = 11 : i64} {
  func.func @_attn_kernel(%arg0: i32, %arg1: i32, %arg2: memref<1x8x32xf32, #tpu.memory_space<vmem>>, %arg3: memref<1x8x32xf32, #tpu.memory_space<vmem>>, %arg4: memref<1x8x32xf32, #tpu.memory_space<vmem>>, %arg5: memref<1x8x8xi8, #tpu.memory_space<vmem>>, %arg6: memref<1x8x32xf32, #tpu.memory_space<vmem>>) attributes {dimension_semantics = [#tpu.dimension_semantics<parallel>, #tpu.dimension_semantics<parallel>], iteration_bounds = array<i64: 2, 1>, scalar_prefetch = 0 : i64, scratch_operands = 0 : i64, tpu.core_type = #tpu.core_type<tc>, window_params = [{transform_indices = @transform_0, window_bounds = array<i64: 1, 8, 32>}, {transform_indices = @transform_1, window_bounds = array<i64: 1, 8, 32>}, {transform_indices = @transform_2, window_bounds = array<i64: 1, 8, 32>}, {transform_indices = @transform_3, window_bounds = array<i64: 1, 8, 8>}, {transform_indices = @transform_4, window_bounds = array<i64: 1, 8, 32>}]} {
    %c0 = arith.constant 0 : index
    %c0_0 = arith.constant 0 : index
    %c0_1 = arith.constant 0 : index
    %0 = vector.load %arg2[%c0, %c0_0, %c0_1] : memref<1x8x32xf32, #tpu.memory_space<vmem>>, vector<1x8x32xf32>
    %1 = vector.shape_cast %0 : vector<1x8x32xf32> to vector<8x32xf32>
    %c0_2 = arith.constant 0 : index
    %c0_3 = arith.constant 0 : index
    %c0_4 = arith.constant 0 : index
    %2 = vector.load %arg3[%c0_2, %c0_3, %c0_4] : memref<1x8x32xf32, #tpu.memory_space<vmem>>, vector<1x8x32xf32>
    %3 = vector.shape_cast %2 : vector<1x8x32xf32> to vector<8x32xf32>
    %c0_5 = arith.constant 0 : index
    %c0_6 = arith.constant 0 : index
    %c0_7 = arith.constant 0 : index
    %4 = vector.load %arg4[%c0_5, %c0_6, %c0_7] : memref<1x8x32xf32, #tpu.memory_space<vmem>>, vector<1x8x32xf32>
    %5 = vector.shape_cast %4 : vector<1x8x32xf32> to vector<8x32xf32>
    %c0_8 = arith.constant 0 : index
    %c0_9 = arith.constant 0 : index
    %c0_10 = arith.constant 0 : index
    %6 = vector.load %arg5[%c0_8, %c0_9, %c0_10] : memref<1x8x8xi8, #tpu.memory_space<vmem>>, vector<1x8x8xi8>
    %7 = vector.shape_cast %6 : vector<1x8x8xi8> to vector<8x8xi8>
    %8 = arith.sitofp %7 : vector<8x8xi8> to vector<8x8xf32>
    %9 = vector.extract_strided_slice %1 {offsets = [0, 0], sizes = [8, 8], strides = [1, 1]} : vector<8x32xf32> to vector<8x8xf32>
    %10 = vector.extract_strided_slice %3 {offsets = [0, 0], sizes = [8, 8], strides = [1, 1]} : vector<8x32xf32> to vector<8x8xf32>
    %11 = vector.extract_strided_slice %5 {offsets = [0, 0], sizes = [8, 8], strides = [1, 1]} : vector<8x32xf32> to vector<8x8xf32>
    %12 = tpu.transpose %10, [1, 0] : vector<8x8xf32> -> vector<8x8xf32>
    %cst = arith.constant dense<0.000000e+00> : vector<8x8xf32>
    %13 = tpu.matmul %9, %12, %cst {dimension_numbers = #tpu.dot_dimension_numbers<[1], [0], [0], [1], [0, 0, 1, 1], [], []>} : vector<8x8xf32>, vector<8x8xf32>, vector<8x8xf32> -> vector<8x8xf32>
    %cst_11 = arith.constant 0.353553385 : f32
    %14 = vector.broadcast %cst_11 : f32 to vector<8x8xf32>
    %15 = arith.mulf %13, %14 : vector<8x8xf32>
    %cst_12 = arith.constant 0.000000e+00 : f32
    %16 = vector.broadcast %cst_12 : f32 to vector<8x8xf32>
    %17 = arith.cmpf oeq, %8, %16 : vector<8x8xf32>
    %cst_13 = arith.constant -1.000000e+09 : f32
    %18 = vector.broadcast %cst_13 : f32 to vector<8x8xf32>
    %19 = arith.select %17, %18, %15 : vector<8x8xi1>, vector<8x8xf32>
    %cst_14 = arith.constant dense<0xFF800000> : vector<8xf32>
    %20 = vector.multi_reduction <maximumf>, %19, %cst_14 [1] : vector<8x8xf32> to vector<8xf32>
    %21 = vector.shape_cast %20 : vector<8xf32> to vector<8x1xf32>
    %22 = vector.broadcast %21 : vector<8x1xf32> to vector<8x8xf32>
    %23 = arith.subf %19, %22 : vector<8x8xf32>
    %24 = math.exp %23 : vector<8x8xf32>
    %cst_15 = arith.constant dense<0.000000e+00> : vector<8xf32>
    %25 = vector.multi_reduction <add>, %24, %cst_15 [1] : vector<8x8xf32> to vector<8xf32>
    %26 = vector.shape_cast %25 : vector<8xf32> to vector<8x1xf32>
    %27 = tpu.reciprocal %26 {approx = true} : vector<8x1xf32> -> vector<8x1xf32>
    %28 = vector.broadcast %27 : vector<8x1xf32> to vector<8x8xf32>
    %29 = arith.mulf %24, %28 : vector<8x8xf32>
    %cst_16 = arith.constant dense<0.000000e+00> : vector<8x8xf32>
    %30 = tpu.matmul %29, %11, %cst_16 {dimension_numbers = #tpu.dot_dimension_numbers<[1], [0], [0], [1], [0, 0, 1, 1], [], []>} : vector<8x8xf32>, vector<8x8xf32>, vector<8x8xf32> -> vector<8x8xf32>
    %31 = vector.extract_strided_slice %1 {offsets = [0, 8], sizes = [8, 8], strides = [1, 1]} : vector<8x32xf32> to vector<8x8xf32>
    %32 = vector.extract_strided_slice %3 {offsets = [0, 8], sizes = [8, 8], strides = [1, 1]} : vector<8x32xf32> to vector<8x8xf32>
    %33 = vector.extract_strided_slice %5 {offsets = [0, 8], sizes = [8, 8], strides = [1, 1]} : vector<8x32xf32> to vector<8x8xf32>
    %34 = tpu.transpose %32, [1, 0] : vector<8x8xf32> -> vector<8x8xf32>
    %cst_17 = arith.constant dense<0.000000e+00> : vector<8x8xf32>
    %35 = tpu.matmul %31, %34, %cst_17 {dimension_numbers = #tpu.dot_dimension_numbers<[1], [0], [0], [1], [0, 0, 1, 1], [], []>} : vector<8x8xf32>, vector<8x8xf32>, vector<8x8xf32> -> vector<8x8xf32>
    %cst_18 = arith.constant 0.353553385 : f32
    %36 = vector.broadcast %cst_18 : f32 to vector<8x8xf32>
    %37 = arith.mulf %35, %36 : vector<8x8xf32>
    %cst_19 = arith.constant 0.000000e+00 : f32
    %38 = vector.broadcast %cst_19 : f32 to vector<8x8xf32>
    %39 = arith.cmpf oeq, %8, %38 : vector<8x8xf32>
    %cst_20 = arith.constant -1.000000e+09 : f32
    %40 = vector.broadcast %cst_20 : f32 to vector<8x8xf32>
    %41 = arith.select %39, %40, %37 : vector<8x8xi1>, vector<8x8xf32>
    %cst_21 = arith.constant dense<0xFF800000> : vector<8xf32>
    %42 = vector.multi_reduction <maximumf>, %41, %cst_21 [1] : vector<8x8xf32> to vector<8xf32>
    %43 = vector.shape_cast %42 : vector<8xf32> to vector<8x1xf32>
    %44 = vector.broadcast %43 : vector<8x1xf32> to vector<8x8xf32>
    %45 = arith.subf %41, %44 : vector<8x8xf32>
    %46 = math.exp %45 : vector<8x8xf32>
    %cst_22 = arith.constant dense<0.000000e+00> : vector<8xf32>
    %47 = vector.multi_reduction <add>, %46, %cst_22 [1] : vector<8x8xf32> to vector<8xf32>
    %48 = vector.shape_cast %47 : vector<8xf32> to vector<8x1xf32>
    %49 = tpu.reciprocal %48 {approx = true} : vector<8x1xf32> -> vector<8x1xf32>
    %50 = vector.broadcast %49 : vector<8x1xf32> to vector<8x8xf32>
    %51 = arith.mulf %46, %50 : vector<8x8xf32>
    %cst_23 = arith.constant dense<0.000000e+00> : vector<8x8xf32>
    %52 = tpu.matmul %51, %33, %cst_23 {dimension_numbers = #tpu.dot_dimension_numbers<[1], [0], [0], [1], [0, 0, 1, 1], [], []>} : vector<8x8xf32>, vector<8x8xf32>, vector<8x8xf32> -> vector<8x8xf32>
    %53 = vector.extract_strided_slice %1 {offsets = [0, 16], sizes = [8, 8], strides = [1, 1]} : vector<8x32xf32> to vector<8x8xf32>
    %54 = vector.extract_strided_slice %3 {offsets = [0, 16], sizes = [8, 8], strides = [1, 1]} : vector<8x32xf32> to vector<8x8xf32>
    %55 = vector.extract_strided_slice %5 {offsets = [0, 16], sizes = [8, 8], strides = [1, 1]} : vector<8x32xf32> to vector<8x8xf32>
    %56 = tpu.transpose %54, [1, 0] : vector<8x8xf32> -> vector<8x8xf32>
    %cst_24 = arith.constant dense<0.000000e+00> : vector<8x8xf32>
    %57 = tpu.matmul %53, %56, %cst_24 {dimension_numbers = #tpu.dot_dimension_numbers<[1], [0], [0], [1], [0, 0, 1, 1], [], []>} : vector<8x8xf32>, vector<8x8xf32>, vector<8x8xf32> -> vector<8x8xf32>
    %cst_25 = arith.constant 0.353553385 : f32
    %58 = vector.broadcast %cst_25 : f32 to vector<8x8xf32>
    %59 = arith.mulf %57, %58 : vector<8x8xf32>
    %cst_26 = arith.constant 0.000000e+00 : f32
    %60 = vector.broadcast %cst_26 : f32 to vector<8x8xf32>
    %61 = arith.cmpf oeq, %8, %60 : vector<8x8xf32>
    %cst_27 = arith.constant -1.000000e+09 : f32
    %62 = vector.broadcast %cst_27 : f32 to vector<8x8xf32>
    %63 = arith.select %61, %62, %59 : vector<8x8xi1>, vector<8x8xf32>
    %cst_28 = arith.constant dense<0xFF800000> : vector<8xf32>
    %64 = vector.multi_reduction <maximumf>, %63, %cst_28 [1] : vector<8x8xf32> to vector<8xf32>
    %65 = vector.shape_cast %64 : vector<8xf32> to vector<8x1xf32>
    %66 = vector.broadcast %65 : vector<8x1xf32> to vector<8x8xf32>
    %67 = arith.subf %63, %66 : vector<8x8xf32>
    %68 = math.exp %67 : vector<8x8xf32>
    %cst_29 = arith.constant dense<0.000000e+00> : vector<8xf32>
    %69 = vector.multi_reduction <add>, %68, %cst_29 [1] : vector<8x8xf32> to vector<8xf32>
    %70 = vector.shape_cast %69 : vector<8xf32> to vector<8x1xf32>
    %71 = tpu.reciprocal %70 {approx = true} : vector<8x1xf32> -> vector<8x1xf32>
    %72 = vector.broadcast %71 : vector<8x1xf32> to vector<8x8xf32>
    %73 = arith.mulf %68, %72 : vector<8x8xf32>
    %cst_30 = arith.constant dense<0.000000e+00> : vector<8x8xf32>
    %74 = tpu.matmul %73, %55, %cst_30 {dimension_numbers = #tpu.dot_dimension_numbers<[1], [0], [0], [1], [0, 0, 1, 1], [], []>} : vector<8x8xf32>, vector<8x8xf32>, vector<8x8xf32> -> vector<8x8xf32>
    %75 = vector.extract_strided_slice %1 {offsets = [0, 24], sizes = [8, 8], strides = [1, 1]} : vector<8x32xf32> to vector<8x8xf32>
    %76 = vector.extract_strided_slice %3 {offsets = [0, 24], sizes = [8, 8], strides = [1, 1]} : vector<8x32xf32> to vector<8x8xf32>
    %77 = vector.extract_strided_slice %5 {offsets = [0, 24], sizes = [8, 8], strides = [1, 1]} : vector<8x32xf32> to vector<8x8xf32>
    %78 = tpu.transpose %76, [1, 0] : vector<8x8xf32> -> vector<8x8xf32>
    %cst_31 = arith.constant dense<0.000000e+00> : vector<8x8xf32>
    %79 = tpu.matmul %75, %78, %cst_31 {dimension_numbers = #tpu.dot_dimension_numbers<[1], [0], [0], [1], [0, 0, 1, 1], [], []>} : vector<8x8xf32>, vector<8x8xf32>, vector<8x8xf32> -> vector<8x8xf32>
    %cst_32 = arith.constant 0.353553385 : f32
    %80 = vector.broadcast %cst_32 : f32 to vector<8x8xf32>
    %81 = arith.mulf %79, %80 : vector<8x8xf32>
    %cst_33 = arith.constant 0.000000e+00 : f32
    %82 = vector.broadcast %cst_33 : f32 to vector<8x8xf32>
    %83 = arith.cmpf oeq, %8, %82 : vector<8x8xf32>
    %cst_34 = arith.constant -1.000000e+09 : f32
    %84 = vector.broadcast %cst_34 : f32 to vector<8x8xf32>
    %85 = arith.select %83, %84, %81 : vector<8x8xi1>, vector<8x8xf32>
    %cst_35 = arith.constant dense<0xFF800000> : vector<8xf32>
    %86 = vector.multi_reduction <maximumf>, %85, %cst_35 [1] : vector<8x8xf32> to vector<8xf32>
    %87 = vector.shape_cast %86 : vector<8xf32> to vector<8x1xf32>
    %88 = vector.broadcast %87 : vector<8x1xf32> to vector<8x8xf32>
    %89 = arith.subf %85, %88 : vector<8x8xf32>
    %90 = math.exp %89 : vector<8x8xf32>
    %cst_36 = arith.constant dense<0.000000e+00> : vector<8xf32>
    %91 = vector.multi_reduction <add>, %90, %cst_36 [1] : vector<8x8xf32> to vector<8xf32>
    %92 = vector.shape_cast %91 : vector<8xf32> to vector<8x1xf32>
    %93 = tpu.reciprocal %92 {approx = true} : vector<8x1xf32> -> vector<8x1xf32>
    %94 = vector.broadcast %93 : vector<8x1xf32> to vector<8x8xf32>
    %95 = arith.mulf %90, %94 : vector<8x8xf32>
    %cst_37 = arith.constant dense<0.000000e+00> : vector<8x8xf32>
    %96 = tpu.matmul %95, %77, %cst_37 {dimension_numbers = #tpu.dot_dimension_numbers<[1], [0], [0], [1], [0, 0, 1, 1], [], []>} : vector<8x8xf32>, vector<8x8xf32>, vector<8x8xf32> -> vector<8x8xf32>
    %97 = tpu.concatenate %30, %52, %74, %96 in 1 : vector<8x8xf32>, vector<8x8xf32>, vector<8x8xf32>, vector<8x8xf32> -> vector<8x32xf32>
    %c0_38 = arith.constant 0 : index
    %c0_39 = arith.constant 0 : index
    %c0_40 = arith.constant 0 : index
    %98 = vector.load %arg6[%c0_38, %c0_39, %c0_40] : memref<1x8x32xf32, #tpu.memory_space<vmem>>, vector<1x8x32xf32>
    %99 = vector.shape_cast %98 : vector<1x8x32xf32> to vector<8x32xf32>
    %100 = vector.shape_cast %97 : vector<8x32xf32> to vector<1x8x32xf32>
    tpu.vector_store %arg6[%c0_38, %c0_39, %c0_40], %100 {strides = array<i32>} : memref<1x8x32xf32, #tpu.memory_space<vmem>>, vector<1x8x32xf32>,
    return
  }
  func.func @transform_0(%arg0: i32, %arg1: i32) -> (i32, i32, i32) {
    %c0_i32 = arith.constant 0 : i32
    %c0_i32_0 = arith.constant 0 : i32
    return %arg0, %c0_i32, %arg1 : i32, i32, i32
  }
  func.func @transform_1(%arg0: i32, %arg1: i32) -> (i32, i32, i32) {
    %c0_i32 = arith.constant 0 : i32
    %c0_i32_0 = arith.constant 0 : i32
    return %arg0, %c0_i32, %arg1 : i32, i32, i32
  }
  func.func @transform_2(%arg0: i32, %arg1: i32) -> (i32, i32, i32) {
    %c0_i32 = arith.constant 0 : i32
    %c0_i32_0 = arith.constant 0 : i32
    return %arg0, %c0_i32, %arg1 : i32, i32, i32
  }
  func.func @transform_3(%arg0: i32, %arg1: i32) -> (i32, i32, i32) {
    %c0_i32 = arith.constant 0 : i32
    %c0_i32_0 = arith.constant 0 : i32
    %c0_i32_1 = arith.constant 0 : i32
    return %arg0, %c0_i32, %c0_i32_0 : i32, i32, i32
  }
  func.func @transform_4(%arg0: i32, %arg1: i32) -> (i32, i32, i32) {
    %c0_i32 = arith.constant 0 : i32
    %c0_i32_0 = arith.constant 0 : i32
    return %arg0, %c0_i32, %arg1 : i32, i32, i32
  }
}

module attributes {stable_mosaic.version = 11 : i64} {
  func.func @_linear_res_kernel(%arg0: i32, %arg1: memref<16x32xf32, #tpu.memory_space<vmem>>, %arg2: memref<16x32xf32, #tpu.memory_space<vmem>>, %arg3: memref<32x32xf32, #tpu.memory_space<vmem>>, %arg4: memref<1x32xf32, #tpu.memory_space<vmem>>, %arg5: memref<16x32xf32, #tpu.memory_space<vmem>>) attributes {dimension_semantics = [#tpu.dimension_semantics<parallel>], iteration_bounds = array<i64: 1>, scalar_prefetch = 0 : i64, scratch_operands = 0 : i64, tpu.core_type = #tpu.core_type<tc>, window_params = [{transform_indices = @transform_0, window_bounds = array<i64: 16, 32>}, {transform_indices = @transform_1, window_bounds = array<i64: 16, 32>}, {pipeline_mode = #tpu.pipeline_mode<synchronous>, transform_indices = @transform_2, window_bounds = array<i64: 32, 32>}, {pipeline_mode = #tpu.pipeline_mode<synchronous>, transform_indices = @transform_3, window_bounds = array<i64: 1, 32>}, {transform_indices = @transform_4, window_bounds = array<i64: 16, 32>}]} {
    %c0 = arith.constant 0 : index
    %c0_0 = arith.constant 0 : index
    %0 = vector.load %arg1[%c0, %c0_0] : memref<16x32xf32, #tpu.memory_space<vmem>>, vector<16x32xf32>
    %c0_1 = arith.constant 0 : index
    %c0_2 = arith.constant 0 : index
    %1 = vector.load %arg3[%c0_1, %c0_2] : memref<32x32xf32, #tpu.memory_space<vmem>>, vector<32x32xf32>
    %cst = arith.constant dense<0.000000e+00> : vector<16x32xf32>
    %2 = tpu.matmul %0, %1, %cst {dimension_numbers = #tpu.dot_dimension_numbers<[1], [0], [0], [1], [0, 0, 1, 1], [], []>} : vector<16x32xf32>, vector<32x32xf32>, vector<16x32xf32> -> vector<16x32xf32>
    %c0_3 = arith.constant 0 : index
    %c0_4 = arith.constant 0 : index
    %3 = vector.load %arg4[%c0_3, %c0_4] : memref<1x32xf32, #tpu.memory_space<vmem>>, vector<1x32xf32>
    %4 = vector.broadcast %3 : vector<1x32xf32> to vector<16x32xf32>
    %5 = arith.addf %2, %4 : vector<16x32xf32>
    %c0_5 = arith.constant 0 : index
    %c0_6 = arith.constant 0 : index
    %6 = vector.load %arg2[%c0_5, %c0_6] : memref<16x32xf32, #tpu.memory_space<vmem>>, vector<16x32xf32>
    %7 = arith.addf %6, %5 : vector<16x32xf32>
    %c0_7 = arith.constant 0 : index
    %c0_8 = arith.constant 0 : index
    %8 = vector.load %arg5[%c0_7, %c0_8] : memref<16x32xf32, #tpu.memory_space<vmem>>, vector<16x32xf32>
    tpu.vector_store %arg5[%c0_7, %c0_8], %7 {strides = array<i32>} : memref<16x32xf32, #tpu.memory_space<vmem>>, vector<16x32xf32>,
    return
  }
  func.func @transform_0(%arg0: i32) -> (i32, i32) {
    %c0_i32 = arith.constant 0 : i32
    %c0_i32_0 = arith.constant 0 : i32
    return %arg0, %c0_i32 : i32, i32
  }
  func.func @transform_1(%arg0: i32) -> (i32, i32) {
    %c0_i32 = arith.constant 0 : i32
    %c0_i32_0 = arith.constant 0 : i32
    return %arg0, %c0_i32 : i32, i32
  }
  func.func @transform_2(%arg0: i32) -> (i32, i32) {
    %c0_i32 = arith.constant 0 : i32
    %c0_i32_0 = arith.constant 0 : i32
    %c0_i32_1 = arith.constant 0 : i32
    return %c0_i32, %c0_i32_0 : i32, i32
  }
  func.func @transform_3(%arg0: i32) -> (i32, i32) {
    %c0_i32 = arith.constant 0 : i32
    %c0_i32_0 = arith.constant 0 : i32
    %c0_i32_1 = arith.constant 0 : i32
    return %c0_i32, %c0_i32_0 : i32, i32
  }
  func.func @transform_4(%arg0: i32) -> (i32, i32) {
    %c0_i32 = arith.constant 0 : i32
    %c0_i32_0 = arith.constant 0 : i32
    return %arg0, %c0_i32 : i32, i32
  }
}

module attributes {stable_mosaic.version = 11 : i64} {
  func.func @_ln_linear_kernel(%arg0: i32, %arg1: memref<16x32xf32, #tpu.memory_space<vmem>>, %arg2: memref<1x32xf32, #tpu.memory_space<vmem>>, %arg3: memref<1x32xf32, #tpu.memory_space<vmem>>, %arg4: memref<32x96xf32, #tpu.memory_space<vmem>>, %arg5: memref<1x96xf32, #tpu.memory_space<vmem>>, %arg6: memref<16x96xf32, #tpu.memory_space<vmem>>) attributes {dimension_semantics = [#tpu.dimension_semantics<parallel>], iteration_bounds = array<i64: 1>, scalar_prefetch = 0 : i64, scratch_operands = 0 : i64, tpu.core_type = #tpu.core_type<tc>, window_params = [{transform_indices = @transform_0, window_bounds = array<i64: 16, 32>}, {pipeline_mode = #tpu.pipeline_mode<synchronous>, transform_indices = @transform_1, window_bounds = array<i64: 1, 32>}, {pipeline_mode = #tpu.pipeline_mode<synchronous>, transform_indices = @transform_2, window_bounds = array<i64: 1, 32>}, {pipeline_mode = #tpu.pipeline_mode<synchronous>, transform_indices = @transform_3, window_bounds = array<i64: 32, 96>}, {pipeline_mode = #tpu.pipeline_mode<synchronous>, transform_indices = @transform_4, window_bounds = array<i64: 1, 96>}, {transform_indices = @transform_5, window_bounds = array<i64: 16, 96>}]} {
    %c0 = arith.constant 0 : index
    %c0_0 = arith.constant 0 : index
    %0 = vector.load %arg1[%c0, %c0_0] : memref<16x32xf32, #tpu.memory_space<vmem>>, vector<16x32xf32>
    %c0_1 = arith.constant 0 : index
    %c0_2 = arith.constant 0 : index
    %1 = vector.load %arg2[%c0_1, %c0_2] : memref<1x32xf32, #tpu.memory_space<vmem>>, vector<1x32xf32>
    %c0_3 = arith.constant 0 : index
    %c0_4 = arith.constant 0 : index
    %2 = vector.load %arg3[%c0_3, %c0_4] : memref<1x32xf32, #tpu.memory_space<vmem>>, vector<1x32xf32>
    %cst = arith.constant dense<0.000000e+00> : vector<16xf32>
    %3 = vector.multi_reduction <add>, %0, %cst [1] : vector<16x32xf32> to vector<16xf32>
    %4 = vector.shape_cast %3 : vector<16xf32> to vector<16x1xf32>
    %cst_5 = arith.constant 3.200000e+01 : f32
    %5 = vector.broadcast %cst_5 : f32 to vector<16x1xf32>
    %6 = arith.divf %4, %5 : vector<16x1xf32>
    %7 = vector.broadcast %6 : vector<16x1xf32> to vector<16x32xf32>
    %8 = arith.subf %0, %7 : vector<16x32xf32>
    %9 = arith.mulf %8, %8 : vector<16x32xf32>
    %cst_6 = arith.constant dense<0.000000e+00> : vector<16xf32>
    %10 = vector.multi_reduction <add>, %9, %cst_6 [1] : vector<16x32xf32> to vector<16xf32>
    %11 = vector.shape_cast %10 : vector<16xf32> to vector<16x1xf32>
    %cst_7 = arith.constant 0.0322580636 : f32
    %12 = vector.broadcast %cst_7 : f32 to vector<16x1xf32>
    %13 = arith.mulf %11, %12 : vector<16x1xf32>
    %14 = math.sqrt %13 : vector<16x1xf32>
    %15 = vector.broadcast %1 : vector<1x32xf32> to vector<16x32xf32>
    %16 = arith.mulf %15, %8 : vector<16x32xf32>
    %cst_8 = arith.constant 9.99999997E-7 : f32
    %17 = vector.broadcast %cst_8 : f32 to vector<16x1xf32>
    %18 = arith.addf %14, %17 : vector<16x1xf32>
    %19 = tpu.reciprocal %18 {approx = true} : vector<16x1xf32> -> vector<16x1xf32>
    %20 = vector.broadcast %19 : vector<16x1xf32> to vector<16x32xf32>
    %21 = arith.mulf %16, %20 : vector<16x32xf32>
    %22 = vector.broadcast %2 : vector<1x32xf32> to vector<16x32xf32>
    %23 = arith.addf %21, %22 : vector<16x32xf32>
    %c0_9 = arith.constant 0 : index
    %c0_10 = arith.constant 0 : index
    %24 = vector.load %arg4[%c0_9, %c0_10] : memref<32x96xf32, #tpu.memory_space<vmem>>, vector<32x96xf32>
    %cst_11 = arith.constant dense<0.000000e+00> : vector<16x96xf32>
    %25 = tpu.matmul %23, %24, %cst_11 {dimension_numbers = #tpu.dot_dimension_numbers<[1], [0], [0], [1], [0, 0, 1, 1], [], []>} : vector<16x32xf32>, vector<32x96xf32>, vector<16x96xf32> -> vector<16x96xf32>
    %c0_12 = arith.constant 0 : index
    %c0_13 = arith.constant 0 : index
    %26 = vector.load %arg5[%c0_12, %c0_13] : memref<1x96xf32, #tpu.memory_space<vmem>>, vector<1x96xf32>
    %27 = vector.broadcast %26 : vector<1x96xf32> to vector<16x96xf32>
    %28 = arith.addf %25, %27 : vector<16x96xf32>
    %c0_14 = arith.constant 0 : index
    %c0_15 = arith.constant 0 : index
    %29 = vector.load %arg6[%c0_14, %c0_15] : memref<16x96xf32, #tpu.memory_space<vmem>>, vector<16x96xf32>
    tpu.vector_store %arg6[%c0_14, %c0_15], %28 {strides = array<i32>} : memref<16x96xf32, #tpu.memory_space<vmem>>, vector<16x96xf32>,
    return
  }
  func.func @transform_0(%arg0: i32) -> (i32, i32) {
    %c0_i32 = arith.constant 0 : i32
    %c0_i32_0 = arith.constant 0 : i32
    return %arg0, %c0_i32 : i32, i32
  }
  func.func @transform_1(%arg0: i32) -> (i32, i32) {
    %c0_i32 = arith.constant 0 : i32
    %c0_i32_0 = arith.constant 0 : i32
    %c0_i32_1 = arith.constant 0 : i32
    return %c0_i32, %c0_i32_0 : i32, i32
  }
  func.func @transform_2(%arg0: i32) -> (i32, i32) {
    %c0_i32 = arith.constant 0 : i32
    %c0_i32_0 = arith.constant 0 : i32
    %c0_i32_1 = arith.constant 0 : i32
    return %c0_i32, %c0_i32_0 : i32, i32
  }
  func.func @transform_3(%arg0: i32) -> (i32, i32) {
    %c0_i32 = arith.constant 0 : i32
    %c0_i32_0 = arith.constant 0 : i32
    %c0_i32_1 = arith.constant 0 : i32
    return %c0_i32, %c0_i32_0 : i32, i32
  }
  func.func @transform_4(%arg0: i32) -> (i32, i32) {
    %c0_i32 = arith.constant 0 : i32
    %c0_i32_0 = arith.constant 0 : i32
    %c0_i32_1 = arith.constant 0 : i32
    return %c0_i32, %c0_i32_0 : i32, i32
  }
  func.func @transform_5(%arg0: i32) -> (i32, i32) {
    %c0_i32 = arith.constant 0 : i32
    %c0_i32_0 = arith.constant 0 : i32
    return %arg0, %c0_i32 : i32, i32
  }
}

module attributes {stable_mosaic.version = 11 : i64} {
  func.func @_linear_kernel(%arg0: i32, %arg1: memref<16x32xf32, #tpu.memory_space<vmem>>, %arg2: memref<32x64xf32, #tpu.memory_space<vmem>>, %arg3: memref<1x64xf32, #tpu.memory_space<vmem>>, %arg4: memref<16x64xf32, #tpu.memory_space<vmem>>) attributes {dimension_semantics = [#tpu.dimension_semantics<parallel>], iteration_bounds = array<i64: 1>, scalar_prefetch = 0 : i64, scratch_operands = 0 : i64, tpu.core_type = #tpu.core_type<tc>, window_params = [{transform_indices = @transform_0, window_bounds = array<i64: 16, 32>}, {pipeline_mode = #tpu.pipeline_mode<synchronous>, transform_indices = @transform_1, window_bounds = array<i64: 32, 64>}, {pipeline_mode = #tpu.pipeline_mode<synchronous>, transform_indices = @transform_2, window_bounds = array<i64: 1, 64>}, {transform_indices = @transform_3, window_bounds = array<i64: 16, 64>}]} {
    %c0 = arith.constant 0 : index
    %c0_0 = arith.constant 0 : index
    %0 = vector.load %arg1[%c0, %c0_0] : memref<16x32xf32, #tpu.memory_space<vmem>>, vector<16x32xf32>
    %c0_1 = arith.constant 0 : index
    %c0_2 = arith.constant 0 : index
    %1 = vector.load %arg2[%c0_1, %c0_2] : memref<32x64xf32, #tpu.memory_space<vmem>>, vector<32x64xf32>
    %cst = arith.constant dense<0.000000e+00> : vector<16x64xf32>
    %2 = tpu.matmul %0, %1, %cst {dimension_numbers = #tpu.dot_dimension_numbers<[1], [0], [0], [1], [0, 0, 1, 1], [], []>} : vector<16x32xf32>, vector<32x64xf32>, vector<16x64xf32> -> vector<16x64xf32>
    %c0_3 = arith.constant 0 : index
    %c0_4 = arith.constant 0 : index
    %3 = vector.load %arg3[%c0_3, %c0_4] : memref<1x64xf32, #tpu.memory_space<vmem>>, vector<1x64xf32>
    %4 = vector.broadcast %3 : vector<1x64xf32> to vector<16x64xf32>
    %5 = arith.addf %2, %4 : vector<16x64xf32>
    %c0_5 = arith.constant 0 : index
    %c0_6 = arith.constant 0 : index
    %6 = vector.load %arg4[%c0_5, %c0_6] : memref<16x64xf32, #tpu.memory_space<vmem>>, vector<16x64xf32>
    tpu.vector_store %arg4[%c0_5, %c0_6], %5 {strides = array<i32>} : memref<16x64xf32, #tpu.memory_space<vmem>>, vector<16x64xf32>,
    return
  }
  func.func @transform_0(%arg0: i32) -> (i32, i32) {
    %c0_i32 = arith.constant 0 : i32
    %c0_i32_0 = arith.constant 0 : i32
    return %arg0, %c0_i32 : i32, i32
  }
  func.func @transform_1(%arg0: i32) -> (i32, i32) {
    %c0_i32 = arith.constant 0 : i32
    %c0_i32_0 = arith.constant 0 : i32
    %c0_i32_1 = arith.constant 0 : i32
    return %c0_i32, %c0_i32_0 : i32, i32
  }
  func.func @transform_2(%arg0: i32) -> (i32, i32) {
    %c0_i32 = arith.constant 0 : i32
    %c0_i32_0 = arith.constant 0 : i32
    %c0_i32_1 = arith.constant 0 : i32
    return %c0_i32, %c0_i32_0 : i32, i32
  }
  func.func @transform_3(%arg0: i32) -> (i32, i32) {
    %c0_i32 = arith.constant 0 : i32
    %c0_i32_0 = arith.constant 0 : i32
    return %arg0, %c0_i32 : i32, i32
  }
}

module attributes {stable_mosaic.version = 11 : i64} {
  func.func @_attn_kernel(%arg0: i32, %arg1: i32, %arg2: memref<1x8x32xf32, #tpu.memory_space<vmem>>, %arg3: memref<1x8x32xf32, #tpu.memory_space<vmem>>, %arg4: memref<1x8x32xf32, #tpu.memory_space<vmem>>, %arg5: memref<1x1x8xi8, #tpu.memory_space<vmem>>, %arg6: memref<1x8x32xf32, #tpu.memory_space<vmem>>) attributes {dimension_semantics = [#tpu.dimension_semantics<parallel>, #tpu.dimension_semantics<parallel>], iteration_bounds = array<i64: 2, 1>, scalar_prefetch = 0 : i64, scratch_operands = 0 : i64, tpu.core_type = #tpu.core_type<tc>, window_params = [{transform_indices = @transform_0, window_bounds = array<i64: 1, 8, 32>}, {transform_indices = @transform_1, window_bounds = array<i64: 1, 8, 32>}, {transform_indices = @transform_2, window_bounds = array<i64: 1, 8, 32>}, {transform_indices = @transform_3, window_bounds = array<i64: 1, 1, 8>}, {transform_indices = @transform_4, window_bounds = array<i64: 1, 8, 32>}]} {
    %c0 = arith.constant 0 : index
    %c0_0 = arith.constant 0 : index
    %c0_1 = arith.constant 0 : index
    %0 = vector.load %arg2[%c0, %c0_0, %c0_1] : memref<1x8x32xf32, #tpu.memory_space<vmem>>, vector<1x8x32xf32>
    %1 = vector.shape_cast %0 : vector<1x8x32xf32> to vector<8x32xf32>
    %c0_2 = arith.constant 0 : index
    %c0_3 = arith.constant 0 : index
    %c0_4 = arith.constant 0 : index
    %2 = vector.load %arg3[%c0_2, %c0_3, %c0_4] : memref<1x8x32xf32, #tpu.memory_space<vmem>>, vector<1x8x32xf32>
    %3 = vector.shape_cast %2 : vector<1x8x32xf32> to vector<8x32xf32>
    %c0_5 = arith.constant 0 : index
    %c0_6 = arith.constant 0 : index
    %c0_7 = arith.constant 0 : index
    %4 = vector.load %arg4[%c0_5, %c0_6, %c0_7] : memref<1x8x32xf32, #tpu.memory_space<vmem>>, vector<1x8x32xf32>
    %5 = vector.shape_cast %4 : vector<1x8x32xf32> to vector<8x32xf32>
    %c0_8 = arith.constant 0 : index
    %c0_9 = arith.constant 0 : index
    %c0_10 = arith.constant 0 : index
    %6 = vector.load %arg5[%c0_8, %c0_9, %c0_10] : memref<1x1x8xi8, #tpu.memory_space<vmem>>, vector<1x1x8xi8>
    %7 = vector.shape_cast %6 : vector<1x1x8xi8> to vector<1x8xi8>
    %8 = arith.sitofp %7 : vector<1x8xi8> to vector<1x8xf32>
    %9 = vector.extract_strided_slice %1 {offsets = [0, 0], sizes = [8, 8], strides = [1, 1]} : vector<8x32xf32> to vector<8x8xf32>
    %10 = vector.extract_strided_slice %3 {offsets = [0, 0], sizes = [8, 8], strides = [1, 1]} : vector<8x32xf32> to vector<8x8xf32>
    %11 = vector.extract_strided_slice %5 {offsets = [0, 0], sizes = [8, 8], strides = [1, 1]} : vector<8x32xf32> to vector<8x8xf32>
    %12 = tpu.transpose %10, [1, 0] : vector<8x8xf32> -> vector<8x8xf32>
    %cst = arith.constant dense<0.000000e+00> : vector<8x8xf32>
    %13 = tpu.matmul %9, %12, %cst {dimension_numbers = #tpu.dot_dimension_numbers<[1], [0], [0], [1], [0, 0, 1, 1], [], []>} : vector<8x8xf32>, vector<8x8xf32>, vector<8x8xf32> -> vector<8x8xf32>
    %cst_11 = arith.constant 0.353553385 : f32
    %14 = vector.broadcast %cst_11 : f32 to vector<8x8xf32>
    %15 = arith.mulf %13, %14 : vector<8x8xf32>
    %cst_12 = arith.constant 0.000000e+00 : f32
    %16 = vector.broadcast %cst_12 : f32 to vector<1x8xf32>
    %17 = arith.cmpf oeq, %8, %16 : vector<1x8xf32>
    %cst_13 = arith.constant -1.000000e+09 : f32
    %18 = vector.shape_cast %17 : vector<1x8xi1> to vector<1x8xi1>
    %19 = vector.broadcast %18 : vector<1x8xi1> to vector<8x8xi1>
    %20 = vector.broadcast %cst_13 : f32 to vector<8x8xf32>
    %21 = arith.select %19, %20, %15 : vector<8x8xi1>, vector<8x8xf32>
    %cst_14 = arith.constant dense<0xFF800000> : vector<8xf32>
    %22 = vector.multi_reduction <maximumf>, %21, %cst_14 [1] : vector<8x8xf32> to vector<8xf32>
    %23 = vector.shape_cast %22 : vector<8xf32> to vector<8x1xf32>
    %24 = vector.broadcast %23 : vector<8x1xf32> to vector<8x8xf32>
    %25 = arith.subf %21, %24 : vector<8x8xf32>
    %26 = math.exp %25 : vector<8x8xf32>
    %cst_15 = arith.constant dense<0.000000e+00> : vector<8xf32>
    %27 = vector.multi_reduction <add>, %26, %cst_15 [1] : vector<8x8xf32> to vector<8xf32>
    %28 = vector.shape_cast %27 : vector<8xf32> to vector<8x1xf32>
    %29 = tpu.reciprocal %28 {approx = true} : vector<8x1xf32> -> vector<8x1xf32>
    %30 = vector.broadcast %29 : vector<8x1xf32> to vector<8x8xf32>
    %31 = arith.mulf %26, %30 : vector<8x8xf32>
    %cst_16 = arith.constant dense<0.000000e+00> : vector<8x8xf32>
    %32 = tpu.matmul %31, %11, %cst_16 {dimension_numbers = #tpu.dot_dimension_numbers<[1], [0], [0], [1], [0, 0, 1, 1], [], []>} : vector<8x8xf32>, vector<8x8xf32>, vector<8x8xf32> -> vector<8x8xf32>
    %33 = vector.extract_strided_slice %1 {offsets = [0, 8], sizes = [8, 8], strides = [1, 1]} : vector<8x32xf32> to vector<8x8xf32>
    %34 = vector.extract_strided_slice %3 {offsets = [0, 8], sizes = [8, 8], strides = [1, 1]} : vector<8x32xf32> to vector<8x8xf32>
    %35 = vector.extract_strided_slice %5 {offsets = [0, 8], sizes = [8, 8], strides = [1, 1]} : vector<8x32xf32> to vector<8x8xf32>
    %36 = tpu.transpose %34, [1, 0] : vector<8x8xf32> -> vector<8x8xf32>
    %cst_17 = arith.constant dense<0.000000e+00> : vector<8x8xf32>
    %37 = tpu.matmul %33, %36, %cst_17 {dimension_numbers = #tpu.dot_dimension_numbers<[1], [0], [0], [1], [0, 0, 1, 1], [], []>} : vector<8x8xf32>, vector<8x8xf32>, vector<8x8xf32> -> vector<8x8xf32>
    %cst_18 = arith.constant 0.353553385 : f32
    %38 = vector.broadcast %cst_18 : f32 to vector<8x8xf32>
    %39 = arith.mulf %37, %38 : vector<8x8xf32>
    %cst_19 = arith.constant 0.000000e+00 : f32
    %40 = vector.broadcast %cst_19 : f32 to vector<1x8xf32>
    %41 = arith.cmpf oeq, %8, %40 : vector<1x8xf32>
    %cst_20 = arith.constant -1.000000e+09 : f32
    %42 = vector.shape_cast %41 : vector<1x8xi1> to vector<1x8xi1>
    %43 = vector.broadcast %42 : vector<1x8xi1> to vector<8x8xi1>
    %44 = vector.broadcast %cst_20 : f32 to vector<8x8xf32>
    %45 = arith.select %43, %44, %39 : vector<8x8xi1>, vector<8x8xf32>
    %cst_21 = arith.constant dense<0xFF800000> : vector<8xf32>
    %46 = vector.multi_reduction <maximumf>, %45, %cst_21 [1] : vector<8x8xf32> to vector<8xf32>
    %47 = vector.shape_cast %46 : vector<8xf32> to vector<8x1xf32>
    %48 = vector.broadcast %47 : vector<8x1xf32> to vector<8x8xf32>
    %49 = arith.subf %45, %48 : vector<8x8xf32>
    %50 = math.exp %49 : vector<8x8xf32>
    %cst_22 = arith.constant dense<0.000000e+00> : vector<8xf32>
    %51 = vector.multi_reduction <add>, %50, %cst_22 [1] : vector<8x8xf32> to vector<8xf32>
    %52 = vector.shape_cast %51 : vector<8xf32> to vector<8x1xf32>
    %53 = tpu.reciprocal %52 {approx = true} : vector<8x1xf32> -> vector<8x1xf32>
    %54 = vector.broadcast %53 : vector<8x1xf32> to vector<8x8xf32>
    %55 = arith.mulf %50, %54 : vector<8x8xf32>
    %cst_23 = arith.constant dense<0.000000e+00> : vector<8x8xf32>
    %56 = tpu.matmul %55, %35, %cst_23 {dimension_numbers = #tpu.dot_dimension_numbers<[1], [0], [0], [1], [0, 0, 1, 1], [], []>} : vector<8x8xf32>, vector<8x8xf32>, vector<8x8xf32> -> vector<8x8xf32>
    %57 = vector.extract_strided_slice %1 {offsets = [0, 16], sizes = [8, 8], strides = [1, 1]} : vector<8x32xf32> to vector<8x8xf32>
    %58 = vector.extract_strided_slice %3 {offsets = [0, 16], sizes = [8, 8], strides = [1, 1]} : vector<8x32xf32> to vector<8x8xf32>
    %59 = vector.extract_strided_slice %5 {offsets = [0, 16], sizes = [8, 8], strides = [1, 1]} : vector<8x32xf32> to vector<8x8xf32>
    %60 = tpu.transpose %58, [1, 0] : vector<8x8xf32> -> vector<8x8xf32>
    %cst_24 = arith.constant dense<0.000000e+00> : vector<8x8xf32>
    %61 = tpu.matmul %57, %60, %cst_24 {dimension_numbers = #tpu.dot_dimension_numbers<[1], [0], [0], [1], [0, 0, 1, 1], [], []>} : vector<8x8xf32>, vector<8x8xf32>, vector<8x8xf32> -> vector<8x8xf32>
    %cst_25 = arith.constant 0.353553385 : f32
    %62 = vector.broadcast %cst_25 : f32 to vector<8x8xf32>
    %63 = arith.mulf %61, %62 : vector<8x8xf32>
    %cst_26 = arith.constant 0.000000e+00 : f32
    %64 = vector.broadcast %cst_26 : f32 to vector<1x8xf32>
    %65 = arith.cmpf oeq, %8, %64 : vector<1x8xf32>
    %cst_27 = arith.constant -1.000000e+09 : f32
    %66 = vector.shape_cast %65 : vector<1x8xi1> to vector<1x8xi1>
    %67 = vector.broadcast %66 : vector<1x8xi1> to vector<8x8xi1>
    %68 = vector.broadcast %cst_27 : f32 to vector<8x8xf32>
    %69 = arith.select %67, %68, %63 : vector<8x8xi1>, vector<8x8xf32>
    %cst_28 = arith.constant dense<0xFF800000> : vector<8xf32>
    %70 = vector.multi_reduction <maximumf>, %69, %cst_28 [1] : vector<8x8xf32> to vector<8xf32>
    %71 = vector.shape_cast %70 : vector<8xf32> to vector<8x1xf32>
    %72 = vector.broadcast %71 : vector<8x1xf32> to vector<8x8xf32>
    %73 = arith.subf %69, %72 : vector<8x8xf32>
    %74 = math.exp %73 : vector<8x8xf32>
    %cst_29 = arith.constant dense<0.000000e+00> : vector<8xf32>
    %75 = vector.multi_reduction <add>, %74, %cst_29 [1] : vector<8x8xf32> to vector<8xf32>
    %76 = vector.shape_cast %75 : vector<8xf32> to vector<8x1xf32>
    %77 = tpu.reciprocal %76 {approx = true} : vector<8x1xf32> -> vector<8x1xf32>
    %78 = vector.broadcast %77 : vector<8x1xf32> to vector<8x8xf32>
    %79 = arith.mulf %74, %78 : vector<8x8xf32>
    %cst_30 = arith.constant dense<0.000000e+00> : vector<8x8xf32>
    %80 = tpu.matmul %79, %59, %cst_30 {dimension_numbers = #tpu.dot_dimension_numbers<[1], [0], [0], [1], [0, 0, 1, 1], [], []>} : vector<8x8xf32>, vector<8x8xf32>, vector<8x8xf32> -> vector<8x8xf32>
    %81 = vector.extract_strided_slice %1 {offsets = [0, 24], sizes = [8, 8], strides = [1, 1]} : vector<8x32xf32> to vector<8x8xf32>
    %82 = vector.extract_strided_slice %3 {offsets = [0, 24], sizes = [8, 8], strides = [1, 1]} : vector<8x32xf32> to vector<8x8xf32>
    %83 = vector.extract_strided_slice %5 {offsets = [0, 24], sizes = [8, 8], strides = [1, 1]} : vector<8x32xf32> to vector<8x8xf32>
    %84 = tpu.transpose %82, [1, 0] : vector<8x8xf32> -> vector<8x8xf32>
    %cst_31 = arith.constant dense<0.000000e+00> : vector<8x8xf32>
    %85 = tpu.matmul %81, %84, %cst_31 {dimension_numbers = #tpu.dot_dimension_numbers<[1], [0], [0], [1], [0, 0, 1, 1], [], []>} : vector<8x8xf32>, vector<8x8xf32>, vector<8x8xf32> -> vector<8x8xf32>
    %cst_32 = arith.constant 0.353553385 : f32
    %86 = vector.broadcast %cst_32 : f32 to vector<8x8xf32>
    %87 = arith.mulf %85, %86 : vector<8x8xf32>
    %cst_33 = arith.constant 0.000000e+00 : f32
    %88 = vector.broadcast %cst_33 : f32 to vector<1x8xf32>
    %89 = arith.cmpf oeq, %8, %88 : vector<1x8xf32>
    %cst_34 = arith.constant -1.000000e+09 : f32
    %90 = vector.shape_cast %89 : vector<1x8xi1> to vector<1x8xi1>
    %91 = vector.broadcast %90 : vector<1x8xi1> to vector<8x8xi1>
    %92 = vector.broadcast %cst_34 : f32 to vector<8x8xf32>
    %93 = arith.select %91, %92, %87 : vector<8x8xi1>, vector<8x8xf32>
    %cst_35 = arith.constant dense<0xFF800000> : vector<8xf32>
    %94 = vector.multi_reduction <maximumf>, %93, %cst_35 [1] : vector<8x8xf32> to vector<8xf32>
    %95 = vector.shape_cast %94 : vector<8xf32> to vector<8x1xf32>
    %96 = vector.broadcast %95 : vector<8x1xf32> to vector<8x8xf32>
    %97 = arith.subf %93, %96 : vector<8x8xf32>
    %98 = math.exp %97 : vector<8x8xf32>
    %cst_36 = arith.constant dense<0.000000e+00> : vector<8xf32>
    %99 = vector.multi_reduction <add>, %98, %cst_36 [1] : vector<8x8xf32> to vector<8xf32>
    %100 = vector.shape_cast %99 : vector<8xf32> to vector<8x1xf32>
    %101 = tpu.reciprocal %100 {approx = true} : vector<8x1xf32> -> vector<8x1xf32>
    %102 = vector.broadcast %101 : vector<8x1xf32> to vector<8x8xf32>
    %103 = arith.mulf %98, %102 : vector<8x8xf32>
    %cst_37 = arith.constant dense<0.000000e+00> : vector<8x8xf32>
    %104 = tpu.matmul %103, %83, %cst_37 {dimension_numbers = #tpu.dot_dimension_numbers<[1], [0], [0], [1], [0, 0, 1, 1], [], []>} : vector<8x8xf32>, vector<8x8xf32>, vector<8x8xf32> -> vector<8x8xf32>
    %105 = tpu.concatenate %32, %56, %80, %104 in 1 : vector<8x8xf32>, vector<8x8xf32>, vector<8x8xf32>, vector<8x8xf32> -> vector<8x32xf32>
    %c0_38 = arith.constant 0 : index
    %c0_39 = arith.constant 0 : index
    %c0_40 = arith.constant 0 : index
    %106 = vector.load %arg6[%c0_38, %c0_39, %c0_40] : memref<1x8x32xf32, #tpu.memory_space<vmem>>, vector<1x8x32xf32>
    %107 = vector.shape_cast %106 : vector<1x8x32xf32> to vector<8x32xf32>
    %108 = vector.shape_cast %105 : vector<8x32xf32> to vector<1x8x32xf32>
    tpu.vector_store %arg6[%c0_38, %c0_39, %c0_40], %108 {strides = array<i32>} : memref<1x8x32xf32, #tpu.memory_space<vmem>>, vector<1x8x32xf32>,
    return
  }
  func.func @transform_0(%arg0: i32, %arg1: i32) -> (i32, i32, i32) {
    %c0_i32 = arith.constant 0 : i32
    %c0_i32_0 = arith.constant 0 : i32
    return %arg0, %c0_i32, %arg1 : i32, i32, i32
  }
  func.func @transform_1(%arg0: i32, %arg1: i32) -> (i32, i32, i32) {
    %c0_i32 = arith.constant 0 : i32
    %c0_i32_0 = arith.constant 0 : i32
    return %arg0, %c0_i32, %arg1 : i32, i32, i32
  }
  func.func @transform_2(%arg0: i32, %arg1: i32) -> (i32, i32, i32) {
    %c0_i32 = arith.constant 0 : i32
    %c0_i32_0 = arith.constant 0 : i32
    return %arg0, %c0_i32, %arg1 : i32, i32, i32
  }
  func.func @transform_3(%arg0: i32, %arg1: i32) -> (i32, i32, i32) {
    %c0_i32 = arith.constant 0 : i32
    %c0_i32_0 = arith.constant 0 : i32
    %c0_i32_1 = arith.constant 0 : i32
    return %arg0, %c0_i32, %c0_i32_0 : i32, i32, i32
  }
  func.func @transform_4(%arg0: i32, %arg1: i32) -> (i32, i32, i32) {
    %c0_i32 = arith.constant 0 : i32
    %c0_i32_0 = arith.constant 0 : i32
    return %arg0, %c0_i32, %arg1 : i32, i32, i32
  }
}

module attributes {stable_mosaic.version = 11 : i64} {
  func.func @_ln_linear_kernel(%arg0: i32, %arg1: memref<16x32xf32, #tpu.memory_space<vmem>>, %arg2: memref<1x32xf32, #tpu.memory_space<vmem>>, %arg3: memref<1x32xf32, #tpu.memory_space<vmem>>, %arg4: memref<32x32xf32, #tpu.memory_space<vmem>>, %arg5: memref<1x32xf32, #tpu.memory_space<vmem>>, %arg6: memref<16x32xf32, #tpu.memory_space<vmem>>) attributes {dimension_semantics = [#tpu.dimension_semantics<parallel>], iteration_bounds = array<i64: 1>, scalar_prefetch = 0 : i64, scratch_operands = 0 : i64, tpu.core_type = #tpu.core_type<tc>, window_params = [{transform_indices = @transform_0, window_bounds = array<i64: 16, 32>}, {pipeline_mode = #tpu.pipeline_mode<synchronous>, transform_indices = @transform_1, window_bounds = array<i64: 1, 32>}, {pipeline_mode = #tpu.pipeline_mode<synchronous>, transform_indices = @transform_2, window_bounds = array<i64: 1, 32>}, {pipeline_mode = #tpu.pipeline_mode<synchronous>, transform_indices = @transform_3, window_bounds = array<i64: 32, 32>}, {pipeline_mode = #tpu.pipeline_mode<synchronous>, transform_indices = @transform_4, window_bounds = array<i64: 1, 32>}, {transform_indices = @transform_5, window_bounds = array<i64: 16, 32>}]} {
    %c0 = arith.constant 0 : index
    %c0_0 = arith.constant 0 : index
    %0 = vector.load %arg1[%c0, %c0_0] : memref<16x32xf32, #tpu.memory_space<vmem>>, vector<16x32xf32>
    %c0_1 = arith.constant 0 : index
    %c0_2 = arith.constant 0 : index
    %1 = vector.load %arg2[%c0_1, %c0_2] : memref<1x32xf32, #tpu.memory_space<vmem>>, vector<1x32xf32>
    %c0_3 = arith.constant 0 : index
    %c0_4 = arith.constant 0 : index
    %2 = vector.load %arg3[%c0_3, %c0_4] : memref<1x32xf32, #tpu.memory_space<vmem>>, vector<1x32xf32>
    %cst = arith.constant dense<0.000000e+00> : vector<16xf32>
    %3 = vector.multi_reduction <add>, %0, %cst [1] : vector<16x32xf32> to vector<16xf32>
    %4 = vector.shape_cast %3 : vector<16xf32> to vector<16x1xf32>
    %cst_5 = arith.constant 3.200000e+01 : f32
    %5 = vector.broadcast %cst_5 : f32 to vector<16x1xf32>
    %6 = arith.divf %4, %5 : vector<16x1xf32>
    %7 = vector.broadcast %6 : vector<16x1xf32> to vector<16x32xf32>
    %8 = arith.subf %0, %7 : vector<16x32xf32>
    %9 = arith.mulf %8, %8 : vector<16x32xf32>
    %cst_6 = arith.constant dense<0.000000e+00> : vector<16xf32>
    %10 = vector.multi_reduction <add>, %9, %cst_6 [1] : vector<16x32xf32> to vector<16xf32>
    %11 = vector.shape_cast %10 : vector<16xf32> to vector<16x1xf32>
    %cst_7 = arith.constant 0.0322580636 : f32
    %12 = vector.broadcast %cst_7 : f32 to vector<16x1xf32>
    %13 = arith.mulf %11, %12 : vector<16x1xf32>
    %14 = math.sqrt %13 : vector<16x1xf32>
    %15 = vector.broadcast %1 : vector<1x32xf32> to vector<16x32xf32>
    %16 = arith.mulf %15, %8 : vector<16x32xf32>
    %cst_8 = arith.constant 9.99999997E-7 : f32
    %17 = vector.broadcast %cst_8 : f32 to vector<16x1xf32>
    %18 = arith.addf %14, %17 : vector<16x1xf32>
    %19 = tpu.reciprocal %18 {approx = true} : vector<16x1xf32> -> vector<16x1xf32>
    %20 = vector.broadcast %19 : vector<16x1xf32> to vector<16x32xf32>
    %21 = arith.mulf %16, %20 : vector<16x32xf32>
    %22 = vector.broadcast %2 : vector<1x32xf32> to vector<16x32xf32>
    %23 = arith.addf %21, %22 : vector<16x32xf32>
    %c0_9 = arith.constant 0 : index
    %c0_10 = arith.constant 0 : index
    %24 = vector.load %arg4[%c0_9, %c0_10] : memref<32x32xf32, #tpu.memory_space<vmem>>, vector<32x32xf32>
    %cst_11 = arith.constant dense<0.000000e+00> : vector<16x32xf32>
    %25 = tpu.matmul %23, %24, %cst_11 {dimension_numbers = #tpu.dot_dimension_numbers<[1], [0], [0], [1], [0, 0, 1, 1], [], []>} : vector<16x32xf32>, vector<32x32xf32>, vector<16x32xf32> -> vector<16x32xf32>
    %c0_12 = arith.constant 0 : index
    %c0_13 = arith.constant 0 : index
    %26 = vector.load %arg5[%c0_12, %c0_13] : memref<1x32xf32, #tpu.memory_space<vmem>>, vector<1x32xf32>
    %27 = vector.broadcast %26 : vector<1x32xf32> to vector<16x32xf32>
    %28 = arith.addf %25, %27 : vector<16x32xf32>
    %c0_14 = arith.constant 0 : index
    %c0_15 = arith.constant 0 : index
    %29 = vector.load %arg6[%c0_14, %c0_15] : memref<16x32xf32, #tpu.memory_space<vmem>>, vector<16x32xf32>
    tpu.vector_store %arg6[%c0_14, %c0_15], %28 {strides = array<i32>} : memref<16x32xf32, #tpu.memory_space<vmem>>, vector<16x32xf32>,
    return
  }
  func.func @transform_0(%arg0: i32) -> (i32, i32) {
    %c0_i32 = arith.constant 0 : i32
    %c0_i32_0 = arith.constant 0 : i32
    return %arg0, %c0_i32 : i32, i32
  }
  func.func @transform_1(%arg0: i32) -> (i32, i32) {
    %c0_i32 = arith.constant 0 : i32
    %c0_i32_0 = arith.constant 0 : i32
    %c0_i32_1 = arith.constant 0 : i32
    return %c0_i32, %c0_i32_0 : i32, i32
  }
  func.func @transform_2(%arg0: i32) -> (i32, i32) {
    %c0_i32 = arith.constant 0 : i32
    %c0_i32_0 = arith.constant 0 : i32
    %c0_i32_1 = arith.constant 0 : i32
    return %c0_i32, %c0_i32_0 : i32, i32
  }
  func.func @transform_3(%arg0: i32) -> (i32, i32) {
    %c0_i32 = arith.constant 0 : i32
    %c0_i32_0 = arith.constant 0 : i32
    %c0_i32_1 = arith.constant 0 : i32
    return %c0_i32, %c0_i32_0 : i32, i32
  }
  func.func @transform_4(%arg0: i32) -> (i32, i32) {
    %c0_i32 = arith.constant 0 : i32
    %c0_i32_0 = arith.constant 0 : i32
    %c0_i32_1 = arith.constant 0 : i32
    return %c0_i32, %c0_i32_0 : i32, i32
  }
  func.func @transform_5(%arg0: i32) -> (i32, i32) {
    %c0_i32 = arith.constant 0 : i32
    %c0_i32_0 = arith.constant 0 : i32
    return %arg0, %c0_i32 : i32, i32
  }
}

module attributes {stable_mosaic.version = 11 : i64} {
  func.func @_ln_ffn_res_kernel(%arg0: i32, %arg1: memref<16x32xf32, #tpu.memory_space<vmem>>, %arg2: memref<1x32xf32, #tpu.memory_space<vmem>>, %arg3: memref<1x32xf32, #tpu.memory_space<vmem>>, %arg4: memref<32x64xf32, #tpu.memory_space<vmem>>, %arg5: memref<1x64xf32, #tpu.memory_space<vmem>>, %arg6: memref<64x32xf32, #tpu.memory_space<vmem>>, %arg7: memref<1x32xf32, #tpu.memory_space<vmem>>, %arg8: memref<16x32xf32, #tpu.memory_space<vmem>>) attributes {dimension_semantics = [#tpu.dimension_semantics<parallel>], iteration_bounds = array<i64: 1>, scalar_prefetch = 0 : i64, scratch_operands = 0 : i64, tpu.core_type = #tpu.core_type<tc>, window_params = [{transform_indices = @transform_0, window_bounds = array<i64: 16, 32>}, {pipeline_mode = #tpu.pipeline_mode<synchronous>, transform_indices = @transform_1, window_bounds = array<i64: 1, 32>}, {pipeline_mode = #tpu.pipeline_mode<synchronous>, transform_indices = @transform_2, window_bounds = array<i64: 1, 32>}, {pipeline_mode = #tpu.pipeline_mode<synchronous>, transform_indices = @transform_3, window_bounds = array<i64: 32, 64>}, {pipeline_mode = #tpu.pipeline_mode<synchronous>, transform_indices = @transform_4, window_bounds = array<i64: 1, 64>}, {pipeline_mode = #tpu.pipeline_mode<synchronous>, transform_indices = @transform_5, window_bounds = array<i64: 64, 32>}, {pipeline_mode = #tpu.pipeline_mode<synchronous>, transform_indices = @transform_6, window_bounds = array<i64: 1, 32>}, {transform_indices = @transform_7, window_bounds = array<i64: 16, 32>}]} {
    %c0 = arith.constant 0 : index
    %c0_0 = arith.constant 0 : index
    %0 = vector.load %arg1[%c0, %c0_0] : memref<16x32xf32, #tpu.memory_space<vmem>>, vector<16x32xf32>
    %c0_1 = arith.constant 0 : index
    %c0_2 = arith.constant 0 : index
    %1 = vector.load %arg2[%c0_1, %c0_2] : memref<1x32xf32, #tpu.memory_space<vmem>>, vector<1x32xf32>
    %c0_3 = arith.constant 0 : index
    %c0_4 = arith.constant 0 : index
    %2 = vector.load %arg3[%c0_3, %c0_4] : memref<1x32xf32, #tpu.memory_space<vmem>>, vector<1x32xf32>
    %cst = arith.constant dense<0.000000e+00> : vector<16xf32>
    %3 = vector.multi_reduction <add>, %0, %cst [1] : vector<16x32xf32> to vector<16xf32>
    %4 = vector.shape_cast %3 : vector<16xf32> to vector<16x1xf32>
    %cst_5 = arith.constant 3.200000e+01 : f32
    %5 = vector.broadcast %cst_5 : f32 to vector<16x1xf32>
    %6 = arith.divf %4, %5 : vector<16x1xf32>
    %7 = vector.broadcast %6 : vector<16x1xf32> to vector<16x32xf32>
    %8 = arith.subf %0, %7 : vector<16x32xf32>
    %9 = arith.mulf %8, %8 : vector<16x32xf32>
    %cst_6 = arith.constant dense<0.000000e+00> : vector<16xf32>
    %10 = vector.multi_reduction <add>, %9, %cst_6 [1] : vector<16x32xf32> to vector<16xf32>
    %11 = vector.shape_cast %10 : vector<16xf32> to vector<16x1xf32>
    %cst_7 = arith.constant 0.0322580636 : f32
    %12 = vector.broadcast %cst_7 : f32 to vector<16x1xf32>
    %13 = arith.mulf %11, %12 : vector<16x1xf32>
    %14 = math.sqrt %13 : vector<16x1xf32>
    %15 = vector.broadcast %1 : vector<1x32xf32> to vector<16x32xf32>
    %16 = arith.mulf %15, %8 : vector<16x32xf32>
    %cst_8 = arith.constant 9.99999997E-7 : f32
    %17 = vector.broadcast %cst_8 : f32 to vector<16x1xf32>
    %18 = arith.addf %14, %17 : vector<16x1xf32>
    %19 = tpu.reciprocal %18 {approx = true} : vector<16x1xf32> -> vector<16x1xf32>
    %20 = vector.broadcast %19 : vector<16x1xf32> to vector<16x32xf32>
    %21 = arith.mulf %16, %20 : vector<16x32xf32>
    %22 = vector.broadcast %2 : vector<1x32xf32> to vector<16x32xf32>
    %23 = arith.addf %21, %22 : vector<16x32xf32>
    %c0_9 = arith.constant 0 : index
    %c0_10 = arith.constant 0 : index
    %24 = vector.load %arg4[%c0_9, %c0_10] : memref<32x64xf32, #tpu.memory_space<vmem>>, vector<32x64xf32>
    %cst_11 = arith.constant dense<0.000000e+00> : vector<16x64xf32>
    %25 = tpu.matmul %23, %24, %cst_11 {dimension_numbers = #tpu.dot_dimension_numbers<[1], [0], [0], [1], [0, 0, 1, 1], [], []>} : vector<16x32xf32>, vector<32x64xf32>, vector<16x64xf32> -> vector<16x64xf32>
    %c0_12 = arith.constant 0 : index
    %c0_13 = arith.constant 0 : index
    %26 = vector.load %arg5[%c0_12, %c0_13] : memref<1x64xf32, #tpu.memory_space<vmem>>, vector<1x64xf32>
    %27 = vector.broadcast %26 : vector<1x64xf32> to vector<16x64xf32>
    %28 = arith.addf %25, %27 : vector<16x64xf32>
    %cst_14 = arith.constant 0.000000e+00 : f32
    %29 = vector.broadcast %cst_14 : f32 to vector<16x64xf32>
    %30 = arith.maximumf %28, %29 : vector<16x64xf32>
    %c0_15 = arith.constant 0 : index
    %c0_16 = arith.constant 0 : index
    %31 = vector.load %arg6[%c0_15, %c0_16] : memref<64x32xf32, #tpu.memory_space<vmem>>, vector<64x32xf32>
    %cst_17 = arith.constant dense<0.000000e+00> : vector<16x32xf32>
    %32 = tpu.matmul %30, %31, %cst_17 {dimension_numbers = #tpu.dot_dimension_numbers<[1], [0], [0], [1], [0, 0, 1, 1], [], []>} : vector<16x64xf32>, vector<64x32xf32>, vector<16x32xf32> -> vector<16x32xf32>
    %c0_18 = arith.constant 0 : index
    %c0_19 = arith.constant 0 : index
    %33 = vector.load %arg7[%c0_18, %c0_19] : memref<1x32xf32, #tpu.memory_space<vmem>>, vector<1x32xf32>
    %34 = vector.broadcast %33 : vector<1x32xf32> to vector<16x32xf32>
    %35 = arith.addf %32, %34 : vector<16x32xf32>
    %36 = arith.addf %0, %35 : vector<16x32xf32>
    %c0_20 = arith.constant 0 : index
    %c0_21 = arith.constant 0 : index
    %37 = vector.load %arg8[%c0_20, %c0_21] : memref<16x32xf32, #tpu.memory_space<vmem>>, vector<16x32xf32>
    tpu.vector_store %arg8[%c0_20, %c0_21], %36 {strides = array<i32>} : memref<16x32xf32, #tpu.memory_space<vmem>>, vector<16x32xf32>,
    return
  }
  func.func @transform_0(%arg0: i32) -> (i32, i32) {
    %c0_i32 = arith.constant 0 : i32
    %c0_i32_0 = arith.constant 0 : i32
    return %arg0, %c0_i32 : i32, i32
  }
  func.func @transform_1(%arg0: i32) -> (i32, i32) {
    %c0_i32 = arith.constant 0 : i32
    %c0_i32_0 = arith.constant 0 : i32
    %c0_i32_1 = arith.constant 0 : i32
    return %c0_i32, %c0_i32_0 : i32, i32
  }
  func.func @transform_2(%arg0: i32) -> (i32, i32) {
    %c0_i32 = arith.constant 0 : i32
    %c0_i32_0 = arith.constant 0 : i32
    %c0_i32_1 = arith.constant 0 : i32
    return %c0_i32, %c0_i32_0 : i32, i32
  }
  func.func @transform_3(%arg0: i32) -> (i32, i32) {
    %c0_i32 = arith.constant 0 : i32
    %c0_i32_0 = arith.constant 0 : i32
    %c0_i32_1 = arith.constant 0 : i32
    return %c0_i32, %c0_i32_0 : i32, i32
  }
  func.func @transform_4(%arg0: i32) -> (i32, i32) {
    %c0_i32 = arith.constant 0 : i32
    %c0_i32_0 = arith.constant 0 : i32
    %c0_i32_1 = arith.constant 0 : i32
    return %c0_i32, %c0_i32_0 : i32, i32
  }
  func.func @transform_5(%arg0: i32) -> (i32, i32) {
    %c0_i32 = arith.constant 0 : i32
    %c0_i32_0 = arith.constant 0 : i32
    %c0_i32_1 = arith.constant 0 : i32
    return %c0_i32, %c0_i32_0 : i32, i32
  }
  func.func @transform_6(%arg0: i32) -> (i32, i32) {
    %c0_i32 = arith.constant 0 : i32
    %c0_i32_0 = arith.constant 0 : i32
    %c0_i32_1 = arith.constant 0 : i32
    return %c0_i32, %c0_i32_0 : i32, i32
  }
  func.func @transform_7(%arg0: i32) -> (i32, i32) {
    %c0_i32 = arith.constant 0 : i32
    %c0_i32_0 = arith.constant 0 : i32
    return %arg0, %c0_i32 : i32, i32
  }
}

module attributes {stable_mosaic.version = 11 : i64} {
  func.func @_layernorm_kernel(%arg0: i32, %arg1: memref<16x32xf32, #tpu.memory_space<vmem>>, %arg2: memref<1x32xf32, #tpu.memory_space<vmem>>, %arg3: memref<1x32xf32, #tpu.memory_space<vmem>>, %arg4: memref<16x32xf32, #tpu.memory_space<vmem>>) attributes {dimension_semantics = [#tpu.dimension_semantics<parallel>], iteration_bounds = array<i64: 1>, scalar_prefetch = 0 : i64, scratch_operands = 0 : i64, tpu.core_type = #tpu.core_type<tc>, window_params = [{transform_indices = @transform_0, window_bounds = array<i64: 16, 32>}, {pipeline_mode = #tpu.pipeline_mode<synchronous>, transform_indices = @transform_1, window_bounds = array<i64: 1, 32>}, {pipeline_mode = #tpu.pipeline_mode<synchronous>, transform_indices = @transform_2, window_bounds = array<i64: 1, 32>}, {transform_indices = @transform_3, window_bounds = array<i64: 16, 32>}]} {
    %c0 = arith.constant 0 : index
    %c0_0 = arith.constant 0 : index
    %0 = vector.load %arg1[%c0, %c0_0] : memref<16x32xf32, #tpu.memory_space<vmem>>, vector<16x32xf32>
    %c0_1 = arith.constant 0 : index
    %c0_2 = arith.constant 0 : index
    %1 = vector.load %arg2[%c0_1, %c0_2] : memref<1x32xf32, #tpu.memory_space<vmem>>, vector<1x32xf32>
    %c0_3 = arith.constant 0 : index
    %c0_4 = arith.constant 0 : index
    %2 = vector.load %arg3[%c0_3, %c0_4] : memref<1x32xf32, #tpu.memory_space<vmem>>, vector<1x32xf32>
    %cst = arith.constant dense<0.000000e+00> : vector<16xf32>
    %3 = vector.multi_reduction <add>, %0, %cst [1] : vector<16x32xf32> to vector<16xf32>
    %4 = vector.shape_cast %3 : vector<16xf32> to vector<16x1xf32>
    %cst_5 = arith.constant 3.200000e+01 : f32
    %5 = vector.broadcast %cst_5 : f32 to vector<16x1xf32>
    %6 = arith.divf %4, %5 : vector<16x1xf32>
    %7 = vector.broadcast %6 : vector<16x1xf32> to vector<16x32xf32>
    %8 = arith.subf %0, %7 : vector<16x32xf32>
    %9 = arith.mulf %8, %8 : vector<16x32xf32>
    %cst_6 = arith.constant dense<0.000000e+00> : vector<16xf32>
    %10 = vector.multi_reduction <add>, %9, %cst_6 [1] : vector<16x32xf32> to vector<16xf32>
    %11 = vector.shape_cast %10 : vector<16xf32> to vector<16x1xf32>
    %cst_7 = arith.constant 0.0322580636 : f32
    %12 = vector.broadcast %cst_7 : f32 to vector<16x1xf32>
    %13 = arith.mulf %11, %12 : vector<16x1xf32>
    %14 = math.sqrt %13 : vector<16x1xf32>
    %15 = vector.broadcast %1 : vector<1x32xf32> to vector<16x32xf32>
    %16 = arith.mulf %15, %8 : vector<16x32xf32>
    %cst_8 = arith.constant 9.99999997E-7 : f32
    %17 = vector.broadcast %cst_8 : f32 to vector<16x1xf32>
    %18 = arith.addf %14, %17 : vector<16x1xf32>
    %19 = tpu.reciprocal %18 {approx = true} : vector<16x1xf32> -> vector<16x1xf32>
    %20 = vector.broadcast %19 : vector<16x1xf32> to vector<16x32xf32>
    %21 = arith.mulf %16, %20 : vector<16x32xf32>
    %22 = vector.broadcast %2 : vector<1x32xf32> to vector<16x32xf32>
    %23 = arith.addf %21, %22 : vector<16x32xf32>
    %c0_9 = arith.constant 0 : index
    %c0_10 = arith.constant 0 : index
    %24 = vector.load %arg4[%c0_9, %c0_10] : memref<16x32xf32, #tpu.memory_space<vmem>>, vector<16x32xf32>
    tpu.vector_store %arg4[%c0_9, %c0_10], %23 {strides = array<i32>} : memref<16x32xf32, #tpu.memory_space<vmem>>, vector<16x32xf32>,
    return
  }
  func.func @transform_0(%arg0: i32) -> (i32, i32) {
    %c0_i32 = arith.constant 0 : i32
    %c0_i32_0 = arith.constant 0 : i32
    return %arg0, %c0_i32 : i32, i32
  }
  func.func @transform_1(%arg0: i32) -> (i32, i32) {
    %c0_i32 = arith.constant 0 : i32
    %c0_i32_0 = arith.constant 0 : i32
    %c0_i32_1 = arith.constant 0 : i32
    return %c0_i32, %c0_i32_0 : i32, i32
  }
  func.func @transform_2(%arg0: i32) -> (i32, i32) {
    %c0_i32 = arith.constant 0 : i32
    %c0_i32_0 = arith.constant 0 : i32
    %c0_i32_1 = arith.constant 0 : i32
    return %c0_i32, %c0_i32_0 : i32, i32
  }
  func.func @transform_3(%arg0: i32) -> (i32, i32) {
    %c0_i32 = arith.constant 0 : i32
    %c0_i32_0 = arith.constant 0 : i32
    return %arg0, %c0_i32 : i32, i32
  }
}

</mosaic_0001>

<bundles_post_ra>
// kernel: decoder_forward.19
= control target key start
LH: loop header
LB: loop body
LE: loop exit
PB: predicated region body
PF: predicated region fallthrough
CT: control target
= control target key end

     0   :  { %vm30_vm0 = vcmask 261120   ;;  %s212_s2 = inlined_call_operand.vmem [shape: f32[32,32], index: 2, kind: input, shape index: {}]   ;;  %s213_s0 = inlined_call_operand.vmem [shape: f32[16,32], index: 0, kind: input, shape index: {}]   ;;  %s214_s3 = inlined_call_operand.vmem [shape: f32[1,32], index: 3, kind: input, shape index: {}]   ;;  %s215_s1 = inlined_call_operand.vmem [shape: f32[16,32], index: 1, kind: input, shape index: {}]   ;;  %s216_s4 = inlined_call_operand.vmem [shape: f32[16,32], index: 4, kind: output, shape index: {}]  }
   0x1   :  { %v19_v0 = vld [vmem:[%s212_s2] sm:$0xff]  ;;  %v20_v1 = vld [vmem:[%s212_s2 + $0x8] sm:$0xff]  ;;  %v21_v2 = vld [vmem:[%s212_s2 + $0x10] sm:$0xff] }
   0x2   :  { %v142_v3 = vpack.c.bf16 %v20_v1, %v19_v0  ;;  %v22_v4 = vld [vmem:[%s212_s2 + $0x18] sm:$0xff]  ;;  %v17_v5 = vld [vmem:[%s213_s0] sm:$0xff]  ;;  %v18_v7 = vld [vmem:[%s213_s0 + $0x8] sm:$0xff] }
   0x3   :  { %v146_v6 = vpack.c.bf16 %v22_v4, %v21_v2  ;;  %139 = vmatprep.mubr.msk.f32.mxu0 %vm30_vm0, %v17_v5  ;;  %v122_v8 = vld [vmem:[%s214_s3] ss:$0 sm:$0xff]  ;;  %v113_v10 = vld [vmem:[%s215_s1 + $0x8] sm:$0xff] }
   0x4   :  { %143 = vmatprep.subr.bf16.mxu0 %v142_v3  ;;  %v112_v13 = vld [vmem:[%s215_s1] sm:$0xff] }
   0x5   :  { %145 = vmatpush3.bf16.msra.mxu0 %v142_v3 }
   0x6   :  { %147 = vmatprep.subr.bf16.mxu0 %v146_v6 }
   0x9   :  { %149 = vmatpush3.bf16.msra.mxu0 %v146_v6 }
   0xc   :  { %140 = vmatmul.mubr.msk.f32.vlgmr.msra.gmra.mrb[0].mxu0 %vm30_vm0, %v18_v7 }
  0xdf   :  { %v141_v9 = vpop.f32.mrb[0].mxu0 }
  0xe0   :  { %v109_v11 = vadd.f32 %v141_v9, %v122_v8  ;;  %v103_v12 = vpop.f32.mrb[1].mxu0 }
  0xe1   :  { %v104_v14 = vadd.f32 %v122_v8, %v103_v12 }
  0xe2   :  { %v115_v15 = vadd.f32 %v113_v10, %v109_v11 }
  0xe3   :  { %v114_v16 = vadd.f32 %v112_v13, %v104_v14 }
  0xe4   :  { %117 = vst.msk [vmem:[%s216_s4 + $0x8] sm:$0xff] %vm30_vm0, %v115_v15 }
  0xe5   :  { %116 = vst.msk [vmem:[%s216_s4] sm:$0xff] %vm30_vm0, %v114_v16 }

// kernel: decoder_forward.18
= control target key start
LH: loop header
LB: loop body
LE: loop exit
PB: predicated region body
PF: predicated region fallthrough
CT: control target
= control target key end

     0   :  { %s1289_s15 = smov 0   ;;  %s1291_s16 = smov 0   ;;  %s1411_s0 = inlined_call_operand.vmem [shape: f32[2,8,32], index: 0, kind: input, shape index: {}]   ;;  %s1412_s1 = inlined_call_operand.vmem [shape: f32[2,8,32], index: 1, kind: input, shape index: {}]   ;;  %s1413_s2 = inlined_call_operand.vmem [shape: f32[2,8,32], index: 2, kind: input, shape index: {}]   ;;  %s1414_s3 = inlined_call_operand.vmem [shape: s8[2,8,8], index: 3, kind: input, shape index: {}]   ;;  %s1415_s4 = inlined_call_operand.vmem [shape: f32[2,8,32], index: 4, kind: output, shape index: {}]  }
   0x1   :  { %s1293_s17 = smov 0  }
   0x2 LB: > { %s26_s18 = sadd.s32 1, %s1250_s16  ;;  %p1108_p0 = scmp.ge.s32.totalorder %s1254_s17, 1  ;;  %s1254_s17 = sphi %s1293_s17, %s14_s17   ;;  %s1250_s16 = sphi %s1291_s16, %s1417_s16   ;;  %s1246_s15 = sphi %s1289_s15, %s1416_s15  }
   0x3   : > { %p28_p1 = scmp.ge.s32.totalorder %s26_s18, 2  ;;  %p217_p2 = scmp.lt.s32.totalorder %s1254_s17, 3 }
   0x5   : > { %s1419_s18 = smov (%p28_p1, %s26_s18), 0  ;;  %p218_p3 = pnand %p1108_p0, %p217_p2 }
   0x6   : > { %p265_p4 = scmp.lt.s32.totalorder (!%p218_p3), %s1246_s15, 1  ;;  %v1256_v0 = vmov (!%p218_p3), 0.0   ;;  %vm1257_vm0 = vmmov (!%p218_p3), 0   ;;  %vm303_vm1 = vcmask (!%p218_p3), 64512   ;;  %s1258_s30 = smov (!%p218_p3), 120   ;;  %vm982_vm3 = vcmask (!%p218_p3), 130048  }
   0x7   : > { %221 = sbr.rel (%p218_p3) target bundleno = 1465 (0x5b9), region = 36  ;;  %1144 = vmatprep.subr.mxu0 (!%p218_p3), %v1256_v0  ;;  %1146 = vmatprep.mubr.msk.f32.mxu0 (!%p218_p3), %vm1257_vm0, %v1256_v0  ;;  %s1259_s5 = smov (!%p218_p3), 112   ;;  %vm984_vm4 = vcmask (!%p218_p3), 195584   ;;  %vm986_vm5 = vcmask (!%p218_p3), 261120  }
   0x8   : > { %1149 = vmatprep.subr.mxu1 (!%p218_p3), %v1256_v0  ;;  %1151 = vmatprep.mubr.msk.f32.mxu1 (!%p218_p3), %vm1257_vm0, %v1256_v0  ;;  %s1260_s6 = smov (!%p218_p3), 104   ;;  %s1261_s10 = smov (!%p218_p3), 8  }
   0x9   : > { %s1262_s11 = smov (!%p218_p3), 16   ;;  %s1263_s12 = smov (!%p218_p3), 24  }
   0xe   : > { %s1421_s15 = smov (!%p265_p4, %s1246_s15), 1 }
   0xf   : > { %s1313_s19 = sshll.u32 %s1421_s15, 3  ;;  %s1112_s26 = sshll.u32 %s1421_s15, 1 }
  0x10   : > { %s278_s22 = scalar_lea.vmem %s1412_s1, %s1313_s19  ;;  %s271_s25 = scalar_lea.vmem %s1411_s0, %s1313_s19 }
  0x11   : > { %v298_v1 = vld [vmem:[%s278_s22] sm:$0xff]  ;;  %s289_s29 = scalar_lea.vmem %s1414_s3, %s1112_s26  ;;  %s285_s9 = scalar_lea.vmem %s1413_s2, %s1313_s19 }
  0x12   : > { %1145 = vmatpush3.xpose.msk.msra.mxu0 %vm303_vm1, %v298_v1  ;;  %v297_v2 = vld [vmem:[%s271_s25] sm:$0xff]  ;;  %469 = vrot.lane.b32.xlu1 %v298_v1, %s1258_s30  ;;  %s296_s15 = scalar_lea.vmem %s1415_s4, %s1313_s19 }
  0x13   : > { %1159 = vmatprep.subr.mxu0 %v1256_v0  ;;  %v300_v3 = vld [vmem:[%s289_s29] sm:$0x3] }
  0x14   : > { %v301_v4 = vunpack.c.0.s8 %v300_v3  ;;  %v1347_v16 = vld [vmem:[%s285_s9] sm:$0xff] }
  0x15   : > { %1147 = vmatmul.mubr.msk.f32.vlgmr.msra.gmra.mrb[0].mxu0 %vm303_vm1, %v297_v2  ;;  %1150 = vmatpush3.msra.mxu1 %v1347_v16 }
  0x16   : > { %1161 = vmatprep.mubr.msk.f32.mxu0 %vm1257_vm0, %v1256_v0  ;;  %v1331_v5 = vcvt.s32.f32 %v301_v4  ;;  %467 = vrot.lane.b32.xlu1 %v297_v2, %s1258_s30 }
  0x17   : > { %1154 = vmatprep.subr.mxu1 %v1256_v0 }
  0x18   : > { %vm381_vm2 = vcmp.eq.f32.partialorder %v1331_v5, 0.0 }
  0x1a   : > { %635 = vrot.lane.b32.xlu1 %v297_v2, %s1259_s5 }
  0x1e   : > { %804 = vrot.lane.b32.xlu1 %v298_v1, %s1260_s6 }
  0x22   : > { %802 = vrot.lane.b32.xlu1 %v297_v2, %s1260_s6 }
  0x84   : > { %v470_v17 = vpop.permute.xlu1 %469 }
  0x88   : > { %v468_v19 = vpop.permute.xlu1 %467 }
  0x8c   : > { %v636_v21 = vpop.permute.xlu1 %635 }
  0x90   : > { %v805_v24 = vpop.permute.xlu1 %804 }
  0x94   : > { %v803_v25 = vpop.permute.xlu1 %802 }
  0xe8   : > { %v376_v6 = vpop.f32.mrb[0].mxu0 }
  0xe9   : > { %v380_v7 = vmul.f32 0.35355338, %v376_v6  ;;  %v1148_v8 = vpop.f32.mrb[1].mxu0 }
  0xeb   : > { %v382_v9 = vsel %vm381_vm2, -1e+09, %v380_v7 }
  0xec   : > { %v383_v10 = vsel %vm303_vm1, %v382_v9, -inf }
  0xed   : > { %384 = vmax.xlane.f32.xlu0 %v383_v10 }
 0x17a   : > { %v385_v11 = vpop.xlane.xlu0 %384 }
 0x17b   : > { %v386_v12 = vsub.f32 %v382_v9, %v385_v11 }
 0x17d   : > { %v387_v13 = vmul.f32 1.442695, %v386_v12 }
 0x17f   : > { %1216 = vpow2.f32 %v387_v13 }
 0x189   : > { %v1217_v14 = vpop.eup %1216 }
 0x18a   : > { %v389_v15 = vsel %vm303_vm1, %v1217_v14, 0.0 }
 0x18b   : > { %390 = vadd.xlane.f32.xlu0 %v389_v15 }
 0x1a1   : > { %637 = vrot.lane.b32.xlu0 %v298_v1, %s1259_s5 }
 0x218   : > { %v391_v18 = vpop.xlane.xlu0 %390 }
 0x219   : > { %1218 = vrcp.f32 %v391_v18 }
 0x21c   : > { %v638_v23 = vpop.permute.xlu0 %637 }
 0x223   : > { %v1219_v20 = vpop.eup %1218 }
 0x224   : > { %v393_v22 = vmul.f32 %v1219_v20, %v1217_v14 }
 0x226   : > { %1152 = vmatmul.mubr.msk.f32.vlgmr.msra.gmra.mrb[0].mxu1 %vm303_vm1, %v393_v22 }
 0x227   : > { %1155 = vmatpush3.xpose.msk.msra.mxu1 %vm303_vm1, %v470_v17  ;;  %1156 = vmatprep.mubr.msk.f32.mxu1 %vm1257_vm0, %v1256_v0 }
 0x228   : > { %1164 = vmatprep.subr.mxu1 %v1256_v0 }
 0x22a   : > { %1157 = vmatmul.mubr.msk.f32.vlgmr.msra.gmra.mrb[2].mxu1 %vm303_vm1, %v468_v19 }
 0x22b   : > { %1165 = vmatpush3.xpose.msk.msra.mxu1 %vm303_vm1, %v638_v23  ;;  %1166 = vmatprep.mubr.msk.f32.mxu1 %vm1257_vm0, %v1256_v0 }
 0x22c   : > { %1174 = vmatprep.subr.mxu1 %v1256_v0 }
 0x22e   : > { %1167 = vmatmul.mubr.msk.f32.vlgmr.msra.gmra.mrb[4].mxu1 %vm303_vm1, %v636_v21 }
 0x22f   : > { %1175 = vmatpush3.xpose.msk.msra.mxu1 %vm303_vm1, %v805_v24  ;;  %1176 = vmatprep.mubr.msk.f32.mxu1 %vm1257_vm0, %v1256_v0 }
 0x232   : > { %1177 = vmatmul.mubr.msk.f32.vlgmr.msra.gmra.mrb[6].mxu1 %vm303_vm1, %v803_v25 }
 0x2f9   : > { %v1367_v26 = vpop.f32.mrb[0].mxu1 }
 0x2fa   : > { %v1153_v27 = vpop.f32.mrb[1].mxu1 }
 0x2fd   : > { %v541_v28 = vpop.f32.mrb[2].mxu1 }
 0x2fe   : > { %v545_v29 = vmul.f32 0.35355338, %v541_v28  ;;  %v1158_v30 = vpop.f32.mrb[3].mxu1 }
 0x300   : > { %v546_v31 = vsel %vm381_vm2, -1e+09, %v545_v29 }
 0x301   : > { %v709_v32 = vpop.f32.mrb[4].mxu1  ;;  %v547_v33 = vsel %vm303_vm1, %v546_v31, -inf }
 0x302   : > { %v713_v34 = vmul.f32 0.35355338, %v709_v32  ;;  %548 = vmax.xlane.f32.xlu1 %v547_v33  ;;  %v1168_v35 = vpop.f32.mrb[5].mxu1 }
 0x304   : > { %v714_v36 = vsel %vm381_vm2, -1e+09, %v713_v34 }
 0x305   : > { %v876_v37 = vpop.f32.mrb[6].mxu1  ;;  %v715_v38 = vsel %vm303_vm1, %v714_v36, -inf }
 0x306   : > { %v880_v39 = vmul.f32 0.35355338, %v876_v37  ;;  %716 = vmax.xlane.f32.xlu0 %v715_v38  ;;  %v1178_v40 = vpop.f32.mrb[7].mxu1 }
 0x308   : > { %v881_v41 = vsel %vm381_vm2, -1e+09, %v880_v39 }
 0x309   : > { %v882_v42 = vsel %vm303_vm1, %v881_v41, -inf }
 0x30a   : > { %883 = vmax.xlane.f32.xlu1 %v882_v42 }
 0x38f   : > { %v549_v43 = vpop.xlane.xlu1 %548 }
 0x390   : > { %v550_v44 = vsub.f32 %v546_v31, %v549_v43 }
 0x392   : > { %v551_v45 = vmul.f32 1.442695, %v550_v44 }
 0x393   : > { %v717_v46 = vpop.xlane.xlu0 %716 }
 0x394   : > { %1220 = vpow2.f32 %v551_v45  ;;  %v718_v47 = vsub.f32 %v714_v36, %v717_v46 }
 0x396   : > { %v719_v48 = vmul.f32 1.442695, %v718_v47 }
 0x397   : > { %v884_v53 = vpop.xlane.xlu1 %883 }
 0x398   : > { %1222 = vpow2.f32 %v719_v48  ;;  %v885_v54 = vsub.f32 %v881_v41, %v884_v53 }
 0x39a   : > { %v886_v55 = vmul.f32 1.442695, %v885_v54 }
 0x39c   : > { %1224 = vpow2.f32 %v886_v55 }
 0x39e   : > { %v1221_v49 = vpop.eup %1220 }
 0x39f   : > { %v553_v50 = vsel %vm303_vm1, %v1221_v49, 0.0 }
 0x3a0   : > { %554 = vadd.xlane.f32.xlu1 %v553_v50 }
 0x3a2   : > { %v1223_v51 = vpop.eup %1222 }
 0x3a3   : > { %v721_v52 = vsel %vm303_vm1, %v1223_v51, 0.0 }
 0x3a4   : > { %722 = vadd.xlane.f32.xlu0 %v721_v52 }
 0x3a6   : > { %v1225_v56 = vpop.eup %1224 }
 0x3a7   : > { %v888_v57 = vsel %vm303_vm1, %v1225_v56, 0.0 }
 0x3b1   : > { %726 = vrot.lane.b32.xlu1 %v1347_v16, %s1259_s5 }
 0x3ba   : > { %559 = vrot.lane.b32.xlu0 %v1347_v16, %s1258_s30 }
 0x3d5   : > { %889 = vadd.xlane.f32.xlu1 %v888_v57 }
 0x3e6   : > { %893 = vrot.lane.b32.xlu1 %v1347_v16, %s1260_s6 }
 0x42d   : > { %v555_v58 = vpop.xlane.xlu1 %554 }
 0x42e   : > { %1226 = vrcp.f32 %v555_v58 }
 0x431   : > { %v723_v59 = vpop.xlane.xlu0 %722  ;;  %v727_v63 = vpop.permute.xlu1 %726 }
 0x432   : > { %1228 = vrcp.f32 %v723_v59 }
 0x435   : > { %v560_v60 = vpop.permute.xlu0 %559 }
 0x436   : > { %1160 = vmatpush3.msra.mxu0 %v560_v60 }
 0x437   : > { %1169 = vmatprep.subr.mxu0 %v1256_v0 }
 0x438   : > { %v1227_v61 = vpop.eup %1226 }
 0x439   : > { %v557_v62 = vmul.f32 %v1227_v61, %v1221_v49 }
 0x43b   : > { %1162 = vmatmul.mubr.msk.f32.vlgmr.msra.gmra.mrb[2].mxu0 %vm303_vm1, %v557_v62 }
 0x43c   : > { %v1229_v1 = vpop.eup %1228  ;;  %1170 = vmatpush3.msra.mxu0 %v727_v63  ;;  %1171 = vmatprep.mubr.msk.f32.mxu0 %vm1257_vm0, %v1256_v0 }
 0x43d   : > { %v725_v2 = vmul.f32 %v1229_v1, %v1223_v51  ;;  %1179 = vmatprep.subr.mxu0 %v1256_v0 }
 0x43f   : > { %1172 = vmatmul.mubr.msk.f32.vlgmr.msra.gmra.mrb[4].mxu0 %vm303_vm1, %v725_v2 }
 0x440   : > { %1181 = vmatprep.mubr.msk.f32.mxu0 %vm1257_vm0, %v1256_v0 }
 0x462   : > { %v890_v3 = vpop.xlane.xlu1 %889 }
 0x463   : > { %1230 = vrcp.f32 %v890_v3 }
 0x466   : > { %v894_v4 = vpop.permute.xlu1 %893 }
 0x467   : > { %1180 = vmatpush3.msra.mxu0 %v894_v4 }
 0x46d   : > { %v1231_v5 = vpop.eup %1230 }
 0x46e   : > { %v892_v6 = vmul.f32 %v1231_v5, %v1225_v56 }
 0x470   : > { %1182 = vmatmul.mubr.msk.f32.vlgmr.msra.gmra.mrb[6].mxu0 %vm303_vm1, %v892_v6 }
 0x50e   : > { %v631_v7 = vpop.f32.mrb[2].mxu0 }
 0x50f   : > { %970 = vrot.lane.b32.xlu0 %v631_v7, %s1261_s10  ;;  %v1163_v8 = vpop.f32.mrb[3].mxu0 }
 0x512   : > { %v798_v9 = vpop.f32.mrb[4].mxu0 }
 0x513   : > { %974 = vrot.lane.b32.xlu1 %v798_v9, %s1262_s11  ;;  %v1173_v10 = vpop.f32.mrb[5].mxu0 }
 0x543   : > { %v965_v11 = vpop.f32.mrb[6].mxu0 }
 0x544   : > { %978 = vrot.lane.b32.xlu0 %v965_v11, %s1263_s12  ;;  %v1183_v0 = vpop.f32.mrb[7].mxu0 }
 0x581   : > { %v971_v12 = vpop.permute.xlu0 %970 }
 0x582   : > { %v981_v14 = vsel %vm303_vm1, %v1367_v26, %v971_v12 }
 0x585   : > { %v975_v13 = vpop.permute.xlu1 %974 }
 0x586   : > { %v983_v15 = vsel %vm982_vm3, %v981_v14, %v975_v13 }
 0x5b6   : > { %v979_v16 = vpop.permute.xlu0 %978 }
 0x5b7   : > { %v985_v17 = vsel %vm984_vm4, %v983_v15, %v979_v16 }
 0x5b8   : > { %987 = vst.msk [vmem:[%s296_s15] sm:$0xff] %vm986_vm5, %v985_v17 }
 0x5b9 PF: > { %s14_s17 = sadd.s32 1, %s1254_s17   ;;  %s1416_s15 = smov %s1250_s16 }
 0x5ba   : > { %p11_p5 = scmp.ge.s32.totalorder %s14_s17, 4   ;;  %s1417_s16 = smov %s1419_s18 }
 0x5bc   :  { %13 = sbr.rel (!%p11_p5) target bundleno = 2 (0x2), region = 75 }

// kernel: decoder_forward.17
= control target key start
LH: loop header
LB: loop body
LE: loop exit
PB: predicated region body
PF: predicated region fallthrough
CT: control target
= control target key end

     0   :  { %vm24_vm0 = vcmask 261120   ;;  %vm174_vm5 = vcmask 785408   ;;  %s288_s0 = inlined_call_operand.vmem [shape: f32[16,32], index: 0, kind: input, shape index: {}]   ;;  %s289_s3 = inlined_call_operand.vmem [shape: f32[32,96], index: 3, kind: input, shape index: {}]   ;;  %s290_s1 = inlined_call_operand.vmem [shape: f32[1,32], index: 1, kind: input, shape index: {}]   ;;  %s291_s2 = inlined_call_operand.vmem [shape: f32[1,32], index: 2, kind: input, shape index: {}]   ;;  %s292_s4 = inlined_call_operand.vmem [shape: f32[1,96], index: 4, kind: input, shape index: {}]   ;;  %s293_s5 = inlined_call_operand.vmem [shape: f32[16,96], index: 5, kind: output, shape index: {}]  }
   0x1   :  { %v20_v0 = vld [vmem:[%s288_s0] sm:$0xff]  ;;  %v21_v1 = vld [vmem:[%s288_s0 + $0x8] sm:$0xff]  ;;  %v84_v16 = vld [vmem:[%s289_s3 + $0x10] sm:$0xff] }
   0x2   :  { %v25_v2 = vsel %vm24_vm0, %v20_v0, 0.0  ;;  %v28_v3 = vsel %vm24_vm0, %v21_v1, 0.0  ;;  %v82_v14 = vld [vmem:[%s289_s3] sm:$0xff]  ;;  %v83_v15 = vld [vmem:[%s289_s3 + $0x8] sm:$0xff]  ;;  %v85_v18 = vld [vmem:[%s289_s3 + $0x18] sm:$0xff] }
   0x3   :  { %26 = vadd.xlane.f32.xlu0 %v25_v2  ;;  %v203_v17 = vpack.c.bf16 %v83_v15, %v82_v14  ;;  %v207_v19 = vpack.c.bf16 %v85_v18, %v84_v16  ;;  %v181_v36 = vld [vmem:[%s290_s1] ss:$0 sm:$0xff] }
   0x4   :  { %v182_v39 = vld [vmem:[%s291_s2] ss:$0 sm:$0xff] }
   0x5   :  { %204 = vmatprep.subr.bf16.mxu0 %v203_v17  ;;  %v183_v46 = vld [vmem:[%s292_s4] ss:$0 sm:$0xff] }
   0x6   :  { %206 = vmatpush3.bf16.msra.mxu0 %v203_v17 }
   0x7   :  { %29 = vadd.xlane.f32.xlu0 %v28_v3  ;;  %208 = vmatprep.subr.bf16.mxu0 %v207_v19 }
   0xa   :  { %210 = vmatpush3.bf16.msra.mxu0 %v207_v19 }
  0x90   :  { %v27_v4 = vpop.xlane.xlu0 %26 }
  0x91   :  { %v32_v5 = vmul.f32 0.03125, %v27_v4 }
  0x93   :  { %v34_v6 = vsub.f32 %v20_v0, %v32_v5 }
  0x94   :  { %v30_v7 = vpop.xlane.xlu0 %29 }
  0x95   :  { %v33_v8 = vmul.f32 0.03125, %v30_v7  ;;  %v36_v9 = vmul.f32 %v34_v6, %v34_v6  ;;  %v66_v37 = vmul.f32 %v181_v36, %v34_v6 }
  0x97   :  { %v35_v10 = vsub.f32 %v21_v1, %v33_v8  ;;  %v38_v11 = vsel %vm24_vm0, %v36_v9, 0.0 }
  0x98   :  { %39 = vadd.xlane.f32.xlu1 %v38_v11 }
  0x99   :  { %v37_v12 = vmul.f32 %v35_v10, %v35_v10  ;;  %v67_v41 = vmul.f32 %v181_v36, %v35_v10 }
  0x9b   :  { %v41_v13 = vsel %vm24_vm0, %v37_v12, 0.0 }
  0x9c   :  { %42 = vadd.xlane.f32.xlu1 %v41_v13 }
 0x125   :  { %v40_v20 = vpop.xlane.xlu1 %39 }
 0x126   :  { %v44_v21 = vmul.f32 0.032258064, %v40_v20 }
 0x128   :  { %211 = vrsqrt.f32 %v44_v21  ;;  %vm48_vm1 = vcmp.eq.f32.partialorder %v44_v21, inf  ;;  %v51_v26 = vand.u32 2147483648, %v44_v21  ;;  %vm50_vm2 = vcmp.eq.f32.partialorder %v44_v21, 0.0 }
 0x129   :  { %v43_v22 = vpop.xlane.xlu1 %42 }
 0x12a   :  { %v45_v23 = vmul.f32 0.032258064, %v43_v22 }
 0x12c   :  { %213 = vrsqrt.f32 %v45_v23  ;;  %vm55_vm3 = vcmp.eq.f32.partialorder %v45_v23, inf  ;;  %v58_v32 = vand.u32 2147483648, %v45_v23  ;;  %vm57_vm4 = vcmp.eq.f32.partialorder %v45_v23, 0.0 }
 0x132   :  { %v212_v24 = vpop.eup %211 }
 0x133   :  { %v47_v25 = vmul.f32 %v212_v24, %v44_v21 }
 0x135   :  { %v49_v27 = vsel %vm48_vm1, %v44_v21, %v47_v25 }
 0x136   :  { %v214_v28 = vpop.eup %213  ;;  %v52_v29 = vsel %vm50_vm2, %v51_v26, %v49_v27 }
 0x137   :  { %v54_v30 = vmul.f32 %v214_v28, %v45_v23  ;;  %v68_v31 = vadd.f32 1e-06, %v52_v29 }
 0x139   :  { %v56_v33 = vsel %vm55_vm3, %v45_v23, %v54_v30  ;;  %215 = vrcp.f32 %v68_v31 }
 0x13a   :  { %v59_v34 = vsel %vm57_vm4, %v58_v32, %v56_v33 }
 0x13b   :  { %v69_v35 = vadd.f32 1e-06, %v59_v34 }
 0x13d   :  { %217 = vrcp.f32 %v69_v35 }
 0x143   :  { %v216_v38 = vpop.eup %215 }
 0x144   :  { %v72_v40 = vmul.f32 %v216_v38, %v66_v37 }
 0x146   :  { %v80_v42 = vadd.f32 %v182_v39, %v72_v40 }
 0x147   :  { %v218_v43 = vpop.eup %217 }
 0x148   :  { %v73_v44 = vmul.f32 %v218_v43, %v67_v41  ;;  %200 = vmatprep.mubr.msk.f32.mxu0 %vm24_vm0, %v80_v42 }
 0x14a   :  { %v81_v45 = vadd.f32 %v182_v39, %v73_v44 }
 0x14c   :  { %201 = vmatmul.mubr.msk.f32.vlgmr.msra.gmra.mrb[0].mxu0 %vm24_vm0, %v81_v45 }
 0x21f   :  { %v202_v47 = vpop.f32.mrb[0].mxu0 }
 0x220   :  { %v171_v48 = vadd.f32 %v202_v47, %v183_v46  ;;  %v165_v49 = vpop.f32.mrb[1].mxu0 }
 0x221   :  { %v166_v50 = vadd.f32 %v183_v46, %v165_v49 }
 0x222   :  { %176 = vst.msk [vmem:[%s293_s5 + $0x8] sm:$0xff] %vm174_vm5, %v171_v48 }
 0x223   :  { %175 = vst.msk [vmem:[%s293_s5] sm:$0xff] %vm174_vm5, %v166_v50 }

// kernel: decoder_forward.21
= control target key start
LH: loop header
LB: loop body
LE: loop exit
PB: predicated region body
PF: predicated region fallthrough
CT: control target
= control target key end

     0   :  { %vm27_vm0 = vcmask 261120   ;;  %vm109_vm1 = vcmask 523264   ;;  %s191_s1 = inlined_call_operand.vmem [shape: f32[32,64], index: 1, kind: input, shape index: {}]   ;;  %s192_s0 = inlined_call_operand.vmem [shape: f32[16,32], index: 0, kind: input, shape index: {}]   ;;  %s193_s2 = inlined_call_operand.vmem [shape: f32[1,64], index: 2, kind: input, shape index: {}]   ;;  %s194_s3 = inlined_call_operand.vmem [shape: f32[16,64], index: 3, kind: output, shape index: {}]  }
   0x1   :  { %v16_v0 = vld [vmem:[%s191_s1] sm:$0xff]  ;;  %v17_v1 = vld [vmem:[%s191_s1 + $0x8] sm:$0xff]  ;;  %v18_v2 = vld [vmem:[%s191_s1 + $0x10] sm:$0xff] }
   0x2   :  { %v136_v3 = vpack.c.bf16 %v17_v1, %v16_v0  ;;  %v19_v4 = vld [vmem:[%s191_s1 + $0x18] sm:$0xff]  ;;  %v14_v5 = vld [vmem:[%s192_s0] sm:$0xff]  ;;  %v15_v7 = vld [vmem:[%s192_s0 + $0x8] sm:$0xff] }
   0x3   :  { %v140_v6 = vpack.c.bf16 %v19_v4, %v18_v2  ;;  %133 = vmatprep.mubr.msk.f32.mxu0 %vm27_vm0, %v14_v5  ;;  %v116_v8 = vld [vmem:[%s193_s2] ss:$0 sm:$0xff] }
   0x4   :  { %137 = vmatprep.subr.bf16.mxu0 %v136_v3 }
   0x5   :  { %139 = vmatpush3.bf16.msra.mxu0 %v136_v3 }
   0x6   :  { %141 = vmatprep.subr.bf16.mxu0 %v140_v6 }
   0x9   :  { %143 = vmatpush3.bf16.msra.mxu0 %v140_v6 }
   0xc   :  { %134 = vmatmul.mubr.msk.f32.vlgmr.msra.gmra.mrb[0].mxu0 %vm27_vm0, %v15_v7 }
  0xdf   :  { %v135_v9 = vpop.f32.mrb[0].mxu0 }
  0xe0   :  { %v106_v10 = vadd.f32 %v135_v9, %v116_v8  ;;  %v100_v11 = vpop.f32.mrb[1].mxu0 }
  0xe1   :  { %v101_v12 = vadd.f32 %v116_v8, %v100_v11 }
  0xe2   :  { %111 = vst.msk [vmem:[%s194_s3 + $0x8] sm:$0xff] %vm109_vm1, %v106_v10 }
  0xe3   :  { %110 = vst.msk [vmem:[%s194_s3] sm:$0xff] %vm109_vm1, %v101_v12 }

// kernel: decoder_forward.20
= control target key start
LH: loop header
LB: loop body
LE: loop exit
PB: predicated region body
PF: predicated region fallthrough
CT: control target
= control target key end

     0   :  { %vm24_vm0 = vcmask 261120   ;;  %s289_s0 = inlined_call_operand.vmem [shape: f32[16,32], index: 0, kind: input, shape index: {}]   ;;  %s290_s3 = inlined_call_operand.vmem [shape: f32[32,32], index: 3, kind: input, shape index: {}]   ;;  %s291_s1 = inlined_call_operand.vmem [shape: f32[1,32], index: 1, kind: input, shape index: {}]   ;;  %s292_s2 = inlined_call_operand.vmem [shape: f32[1,32], index: 2, kind: input, shape index: {}]   ;;  %s293_s4 = inlined_call_operand.vmem [shape: f32[1,32], index: 4, kind: input, shape index: {}]   ;;  %s294_s5 = inlined_call_operand.vmem [shape: f32[16,32], index: 5, kind: output, shape index: {}]  }
   0x1   :  { %v20_v0 = vld [vmem:[%s289_s0] sm:$0xff]  ;;  %v21_v1 = vld [vmem:[%s289_s0 + $0x8] sm:$0xff]  ;;  %v84_v16 = vld [vmem:[%s290_s3 + $0x10] sm:$0xff] }
   0x2   :  { %v25_v2 = vsel %vm24_vm0, %v20_v0, 0.0  ;;  %v28_v3 = vsel %vm24_vm0, %v21_v1, 0.0  ;;  %v82_v14 = vld [vmem:[%s290_s3] sm:$0xff]  ;;  %v83_v15 = vld [vmem:[%s290_s3 + $0x8] sm:$0xff]  ;;  %v85_v18 = vld [vmem:[%s290_s3 + $0x18] sm:$0xff] }
   0x3   :  { %26 = vadd.xlane.f32.xlu0 %v25_v2  ;;  %v202_v17 = vpack.c.bf16 %v83_v15, %v82_v14  ;;  %v206_v19 = vpack.c.bf16 %v85_v18, %v84_v16  ;;  %v180_v36 = vld [vmem:[%s291_s1] ss:$0 sm:$0xff] }
   0x4   :  { %v181_v39 = vld [vmem:[%s292_s2] ss:$0 sm:$0xff] }
   0x5   :  { %203 = vmatprep.subr.bf16.mxu0 %v202_v17  ;;  %v182_v46 = vld [vmem:[%s293_s4] ss:$0 sm:$0xff] }
   0x6   :  { %205 = vmatpush3.bf16.msra.mxu0 %v202_v17 }
   0x7   :  { %29 = vadd.xlane.f32.xlu0 %v28_v3  ;;  %207 = vmatprep.subr.bf16.mxu0 %v206_v19 }
   0xa   :  { %209 = vmatpush3.bf16.msra.mxu0 %v206_v19 }
  0x90   :  { %v27_v4 = vpop.xlane.xlu0 %26 }
  0x91   :  { %v32_v5 = vmul.f32 0.03125, %v27_v4 }
  0x93   :  { %v34_v6 = vsub.f32 %v20_v0, %v32_v5 }
  0x94   :  { %v30_v7 = vpop.xlane.xlu0 %29 }
  0x95   :  { %v33_v8 = vmul.f32 0.03125, %v30_v7  ;;  %v36_v9 = vmul.f32 %v34_v6, %v34_v6  ;;  %v66_v37 = vmul.f32 %v180_v36, %v34_v6 }
  0x97   :  { %v35_v10 = vsub.f32 %v21_v1, %v33_v8  ;;  %v38_v11 = vsel %vm24_vm0, %v36_v9, 0.0 }
  0x98   :  { %39 = vadd.xlane.f32.xlu1 %v38_v11 }
  0x99   :  { %v37_v12 = vmul.f32 %v35_v10, %v35_v10  ;;  %v67_v41 = vmul.f32 %v180_v36, %v35_v10 }
  0x9b   :  { %v41_v13 = vsel %vm24_vm0, %v37_v12, 0.0 }
  0x9c   :  { %42 = vadd.xlane.f32.xlu1 %v41_v13 }
 0x125   :  { %v40_v20 = vpop.xlane.xlu1 %39 }
 0x126   :  { %v44_v21 = vmul.f32 0.032258064, %v40_v20 }
 0x128   :  { %210 = vrsqrt.f32 %v44_v21  ;;  %vm48_vm1 = vcmp.eq.f32.partialorder %v44_v21, inf  ;;  %v51_v26 = vand.u32 2147483648, %v44_v21  ;;  %vm50_vm2 = vcmp.eq.f32.partialorder %v44_v21, 0.0 }
 0x129   :  { %v43_v22 = vpop.xlane.xlu1 %42 }
 0x12a   :  { %v45_v23 = vmul.f32 0.032258064, %v43_v22 }
 0x12c   :  { %212 = vrsqrt.f32 %v45_v23  ;;  %vm55_vm3 = vcmp.eq.f32.partialorder %v45_v23, inf  ;;  %v58_v32 = vand.u32 2147483648, %v45_v23  ;;  %vm57_vm4 = vcmp.eq.f32.partialorder %v45_v23, 0.0 }
 0x132   :  { %v211_v24 = vpop.eup %210 }
 0x133   :  { %v47_v25 = vmul.f32 %v211_v24, %v44_v21 }
 0x135   :  { %v49_v27 = vsel %vm48_vm1, %v44_v21, %v47_v25 }
 0x136   :  { %v213_v28 = vpop.eup %212  ;;  %v52_v29 = vsel %vm50_vm2, %v51_v26, %v49_v27 }
 0x137   :  { %v54_v30 = vmul.f32 %v213_v28, %v45_v23  ;;  %v68_v31 = vadd.f32 1e-06, %v52_v29 }
 0x139   :  { %v56_v33 = vsel %vm55_vm3, %v45_v23, %v54_v30  ;;  %214 = vrcp.f32 %v68_v31 }
 0x13a   :  { %v59_v34 = vsel %vm57_vm4, %v58_v32, %v56_v33 }
 0x13b   :  { %v69_v35 = vadd.f32 1e-06, %v59_v34 }
 0x13d   :  { %216 = vrcp.f32 %v69_v35 }
 0x143   :  { %v215_v38 = vpop.eup %214 }
 0x144   :  { %v72_v40 = vmul.f32 %v215_v38, %v66_v37 }
 0x146   :  { %v80_v42 = vadd.f32 %v181_v39, %v72_v40 }
 0x147   :  { %v217_v43 = vpop.eup %216 }
 0x148   :  { %v73_v44 = vmul.f32 %v217_v43, %v67_v41  ;;  %199 = vmatprep.mubr.msk.f32.mxu0 %vm24_vm0, %v80_v42 }
 0x14a   :  { %v81_v45 = vadd.f32 %v181_v39, %v73_v44 }
 0x14c   :  { %200 = vmatmul.mubr.msk.f32.vlgmr.msra.gmra.mrb[0].mxu0 %vm24_vm0, %v81_v45 }
 0x21f   :  { %v201_v47 = vpop.f32.mrb[0].mxu0 }
 0x220   :  { %v171_v48 = vadd.f32 %v201_v47, %v182_v46  ;;  %v165_v49 = vpop.f32.mrb[1].mxu0 }
 0x221   :  { %v166_v50 = vadd.f32 %v182_v46, %v165_v49 }
 0x222   :  { %175 = vst.msk [vmem:[%s294_s5 + $0x8] sm:$0xff] %vm24_vm0, %v171_v48 }
 0x223   :  { %174 = vst.msk [vmem:[%s294_s5] sm:$0xff] %vm24_vm0, %v166_v50 }

// kernel: decoder_forward.22
= control target key start
LH: loop header
LB: loop body
LE: loop exit
PB: predicated region body
PF: predicated region fallthrough
CT: control target
= control target key end

     0   :  { %s1290_s15 = smov 0   ;;  %s1292_s16 = smov 0   ;;  %s1412_s0 = inlined_call_operand.vmem [shape: f32[2,8,32], index: 0, kind: input, shape index: {}]   ;;  %s1413_s1 = inlined_call_operand.vmem [shape: f32[2,8,32], index: 1, kind: input, shape index: {}]   ;;  %s1414_s2 = inlined_call_operand.vmem [shape: f32[2,8,32], index: 2, kind: input, shape index: {}]   ;;  %s1415_s3 = inlined_call_operand.vmem [shape: s8[2,1,8], index: 3, kind: input, shape index: {}]   ;;  %s1416_s4 = inlined_call_operand.vmem [shape: f32[2,8,32], index: 4, kind: output, shape index: {}]  }
   0x1   :  { %s1294_s17 = smov 0  }
   0x2 LB: > { %s26_s18 = sadd.s32 1, %s1250_s16  ;;  %p1108_p0 = scmp.ge.s32.totalorder %s1254_s17, 1  ;;  %s1254_s17 = sphi %s1294_s17, %s14_s17   ;;  %s1250_s16 = sphi %s1292_s16, %s1418_s16   ;;  %s1246_s15 = sphi %s1290_s15, %s1417_s15  }
   0x3   : > { %p28_p1 = scmp.ge.s32.totalorder %s26_s18, 2  ;;  %p216_p2 = scmp.lt.s32.totalorder %s1254_s17, 3 }
   0x5   : > { %s1420_s18 = smov (%p28_p1, %s26_s18), 0  ;;  %p217_p3 = pnand %p1108_p0, %p216_p2 }
   0x6   : > { %p263_p4 = scmp.lt.s32.totalorder (!%p217_p3), %s1246_s15, 1  ;;  %v1256_v0 = vmov (!%p217_p3), 0.0   ;;  %vm1257_vm0 = vmmov (!%p217_p3), 0   ;;  %vm300_vm1 = vcmask (!%p217_p3), 64512   ;;  %v380_v5 = vlaneseq (!%p217_p3)  ;;  %s1259_s29 = smov (!%p217_p3), 120  }
   0x7   : > { %220 = sbr.rel (%p217_p3) target bundleno = 1465 (0x5b9), region = 36  ;;  %1143 = vmatprep.subr.mxu0 (!%p217_p3), %v1256_v0  ;;  %1145 = vmatprep.mubr.msk.f32.mxu0 (!%p217_p3), %vm1257_vm0, %v1256_v0  ;;  %v1258_v9 = vmov (!%p217_p3), 0   ;;  %s1260_s30 = smov (!%p217_p3), 112   ;;  %vm985_vm4 = vcmask (!%p217_p3), 130048   ;;  %vm987_vm5 = vcmask (!%p217_p3), 195584   ;;  %vm989_vm6 = vcmask (!%p217_p3), 261120  }
   0x8   : > { %1148 = vmatprep.subr.mxu1 (!%p217_p3), %v1256_v0  ;;  %1150 = vmatprep.mubr.msk.f32.mxu1 (!%p217_p3), %vm1257_vm0, %v1256_v0  ;;  %v381_v7 = vshrl.u32 (!%p217_p3), %v380_v5, 7  ;;  %s1261_s5 = smov (!%p217_p3), 104   ;;  %s1262_s9 = smov (!%p217_p3), 8  }
   0x9   : > { %s1263_s10 = smov (!%p217_p3), 16   ;;  %s1264_s11 = smov (!%p217_p3), 24  }
   0xa   : > { %v382_v8 = vsub.s32 (!%p217_p3), 0, %v381_v7 }
   0xe   : > { %s1422_s15 = smov (!%p263_p4, %s1246_s15), 1 }
   0xf   : > { %s1314_s19 = sshll.u32 %s1422_s15, 3  ;;  %s286_s28 = scalar_lea.vmem %s1415_s3, %s1422_s15 }
  0x10   : > { %s276_s22 = scalar_lea.vmem %s1413_s1, %s1314_s19  ;;  %s269_s25 = scalar_lea.vmem %s1412_s0, %s1314_s19  ;;  %v297_v3 = vld [vmem:[%s286_s28] sm:$0x1] }
  0x11   : > { %v295_v1 = vld [vmem:[%s276_s22] sm:$0xff]  ;;  %v298_v4 = vunpack.c.0.s8 %v297_v3  ;;  %s283_s8 = scalar_lea.vmem %s1414_s2, %s1314_s19  ;;  %s293_s14 = scalar_lea.vmem %s1416_s4, %s1314_s19 }
  0x12   : > { %1144 = vmatpush3.xpose.msk.msra.mxu0 %vm300_vm1, %v295_v1  ;;  %v294_v2 = vld [vmem:[%s269_s25] sm:$0xff]  ;;  %472 = vrot.lane.b32.xlu1 %v295_v1, %s1259_s29 }
  0x13   : > { %1158 = vmatprep.subr.mxu0 %v1256_v0  ;;  %v299_v6 = vcvt.s32.f32 %v298_v4  ;;  %v1348_v22 = vld [vmem:[%s283_s8] sm:$0xff] }
  0x14   : > { %1149 = vmatpush3.msra.mxu1 %v1348_v22 }
  0x15   : > { %1146 = vmatmul.mubr.msk.f32.vlgmr.msra.gmra.mrb[0].mxu0 %vm300_vm1, %v294_v2  ;;  %vm378_vm2 = vcmp.eq.f32.partialorder %v299_v6, 0.0  ;;  %1153 = vmatprep.subr.mxu1 %v1256_v0 }
  0x16   : > { %1160 = vmatprep.mubr.msk.f32.mxu0 %vm1257_vm0, %v1256_v0  ;;  %v379_v10 = vsel %vm378_vm2, 1, %v1258_v9  ;;  %470 = vrot.lane.b32.xlu1 %v294_v2, %s1259_s29 }
  0x17   : > { %v1332_v11 = vrot.slane %v379_v10, %v382_v8 }
  0x19   : > { %vm384_vm3 = vcmp.eq.s32.totalorder %v1332_v11, 1 }
  0x1a   : > { %638 = vrot.lane.b32.xlu1 %v294_v2, %s1260_s30 }
  0x1e   : > { %807 = vrot.lane.b32.xlu1 %v295_v1, %s1261_s5 }
  0x22   : > { %805 = vrot.lane.b32.xlu1 %v294_v2, %s1261_s5 }
  0x84   : > { %v473_v23 = vpop.permute.xlu1 %472 }
  0x88   : > { %v471_v25 = vpop.permute.xlu1 %470 }
  0x8c   : > { %v639_v27 = vpop.permute.xlu1 %638 }
  0x90   : > { %v808_v30 = vpop.permute.xlu1 %807 }
  0x94   : > { %v806_v31 = vpop.permute.xlu1 %805 }
  0xe8   : > { %v373_v12 = vpop.f32.mrb[0].mxu0 }
  0xe9   : > { %v377_v13 = vmul.f32 0.35355338, %v373_v12  ;;  %v1147_v14 = vpop.f32.mrb[1].mxu0 }
  0xeb   : > { %v385_v15 = vsel %vm384_vm3, -1e+09, %v377_v13 }
  0xec   : > { %v386_v16 = vsel %vm300_vm1, %v385_v15, -inf }
  0xed   : > { %387 = vmax.xlane.f32.xlu0 %v386_v16 }
 0x17a   : > { %v388_v17 = vpop.xlane.xlu0 %387 }
 0x17b   : > { %v389_v18 = vsub.f32 %v385_v15, %v388_v17 }
 0x17d   : > { %v390_v19 = vmul.f32 1.442695, %v389_v18 }
 0x17f   : > { %1216 = vpow2.f32 %v390_v19 }
 0x189   : > { %v1217_v20 = vpop.eup %1216 }
 0x18a   : > { %v392_v21 = vsel %vm300_vm1, %v1217_v20, 0.0 }
 0x18b   : > { %393 = vadd.xlane.f32.xlu0 %v392_v21 }
 0x1a1   : > { %640 = vrot.lane.b32.xlu0 %v295_v1, %s1260_s30 }
 0x218   : > { %v394_v24 = vpop.xlane.xlu0 %393 }
 0x219   : > { %1218 = vrcp.f32 %v394_v24 }
 0x21c   : > { %v641_v29 = vpop.permute.xlu0 %640 }
 0x223   : > { %v1219_v26 = vpop.eup %1218 }
 0x224   : > { %v396_v28 = vmul.f32 %v1219_v26, %v1217_v20 }
 0x226   : > { %1151 = vmatmul.mubr.msk.f32.vlgmr.msra.gmra.mrb[0].mxu1 %vm300_vm1, %v396_v28 }
 0x227   : > { %1154 = vmatpush3.xpose.msk.msra.mxu1 %vm300_vm1, %v473_v23  ;;  %1155 = vmatprep.mubr.msk.f32.mxu1 %vm1257_vm0, %v1256_v0 }
 0x228   : > { %1163 = vmatprep.subr.mxu1 %v1256_v0 }
 0x22a   : > { %1156 = vmatmul.mubr.msk.f32.vlgmr.msra.gmra.mrb[2].mxu1 %vm300_vm1, %v471_v25 }
 0x22b   : > { %1164 = vmatpush3.xpose.msk.msra.mxu1 %vm300_vm1, %v641_v29  ;;  %1165 = vmatprep.mubr.msk.f32.mxu1 %vm1257_vm0, %v1256_v0 }
 0x22c   : > { %1173 = vmatprep.subr.mxu1 %v1256_v0 }
 0x22e   : > { %1166 = vmatmul.mubr.msk.f32.vlgmr.msra.gmra.mrb[4].mxu1 %vm300_vm1, %v639_v27 }
 0x22f   : > { %1174 = vmatpush3.xpose.msk.msra.mxu1 %vm300_vm1, %v808_v30  ;;  %1175 = vmatprep.mubr.msk.f32.mxu1 %vm1257_vm0, %v1256_v0 }
 0x232   : > { %1176 = vmatmul.mubr.msk.f32.vlgmr.msra.gmra.mrb[6].mxu1 %vm300_vm1, %v806_v31 }
 0x2f9   : > { %v1368_v32 = vpop.f32.mrb[0].mxu1 }
 0x2fa   : > { %v1152_v33 = vpop.f32.mrb[1].mxu1 }
 0x2fd   : > { %v544_v34 = vpop.f32.mrb[2].mxu1 }
 0x2fe   : > { %v548_v35 = vmul.f32 0.35355338, %v544_v34  ;;  %v1157_v36 = vpop.f32.mrb[3].mxu1 }
 0x300   : > { %v549_v37 = vsel %vm384_vm3, -1e+09, %v548_v35 }
 0x301   : > { %v712_v38 = vpop.f32.mrb[4].mxu1  ;;  %v550_v39 = vsel %vm300_vm1, %v549_v37, -inf }
 0x302   : > { %v716_v40 = vmul.f32 0.35355338, %v712_v38  ;;  %551 = vmax.xlane.f32.xlu1 %v550_v39  ;;  %v1167_v41 = vpop.f32.mrb[5].mxu1 }
 0x304   : > { %v717_v42 = vsel %vm384_vm3, -1e+09, %v716_v40 }
 0x305   : > { %v879_v43 = vpop.f32.mrb[6].mxu1  ;;  %v718_v44 = vsel %vm300_vm1, %v717_v42, -inf }
 0x306   : > { %v883_v45 = vmul.f32 0.35355338, %v879_v43  ;;  %719 = vmax.xlane.f32.xlu0 %v718_v44  ;;  %v1177_v46 = vpop.f32.mrb[7].mxu1 }
 0x308   : > { %v884_v47 = vsel %vm384_vm3, -1e+09, %v883_v45 }
 0x309   : > { %v885_v48 = vsel %vm300_vm1, %v884_v47, -inf }
 0x30a   : > { %886 = vmax.xlane.f32.xlu1 %v885_v48 }
 0x38f   : > { %v552_v49 = vpop.xlane.xlu1 %551 }
 0x390   : > { %v553_v50 = vsub.f32 %v549_v37, %v552_v49 }
 0x392   : > { %v554_v51 = vmul.f32 1.442695, %v553_v50 }
 0x393   : > { %v720_v52 = vpop.xlane.xlu0 %719 }
 0x394   : > { %1220 = vpow2.f32 %v554_v51  ;;  %v721_v53 = vsub.f32 %v717_v42, %v720_v52 }
 0x396   : > { %v722_v54 = vmul.f32 1.442695, %v721_v53 }
 0x397   : > { %v887_v59 = vpop.xlane.xlu1 %886 }
 0x398   : > { %1222 = vpow2.f32 %v722_v54  ;;  %v888_v60 = vsub.f32 %v884_v47, %v887_v59 }
 0x39a   : > { %v889_v61 = vmul.f32 1.442695, %v888_v60 }
 0x39c   : > { %1224 = vpow2.f32 %v889_v61 }
 0x39e   : > { %v1221_v55 = vpop.eup %1220 }
 0x39f   : > { %v556_v56 = vsel %vm300_vm1, %v1221_v55, 0.0 }
 0x3a0   : > { %557 = vadd.xlane.f32.xlu1 %v556_v56 }
 0x3a2   : > { %v1223_v57 = vpop.eup %1222 }
 0x3a3   : > { %v724_v58 = vsel %vm300_vm1, %v1223_v57, 0.0 }
 0x3a4   : > { %725 = vadd.xlane.f32.xlu0 %v724_v58 }
 0x3a6   : > { %v1225_v62 = vpop.eup %1224 }
 0x3a7   : > { %v891_v63 = vsel %vm300_vm1, %v1225_v62, 0.0 }
 0x3b1   : > { %729 = vrot.lane.b32.xlu1 %v1348_v22, %s1260_s30 }
 0x3ba   : > { %562 = vrot.lane.b32.xlu0 %v1348_v22, %s1259_s29 }
 0x3d5   : > { %892 = vadd.xlane.f32.xlu1 %v891_v63 }
 0x3e6   : > { %896 = vrot.lane.b32.xlu1 %v1348_v22, %s1261_s5 }
 0x42d   : > { %v558_v1 = vpop.xlane.xlu1 %557 }
 0x42e   : > { %1226 = vrcp.f32 %v558_v1 }
 0x431   : > { %v726_v2 = vpop.xlane.xlu0 %725  ;;  %v730_v6 = vpop.permute.xlu1 %729 }
 0x432   : > { %1228 = vrcp.f32 %v726_v2 }
 0x435   : > { %v563_v3 = vpop.permute.xlu0 %562 }
 0x436   : > { %1159 = vmatpush3.msra.mxu0 %v563_v3 }
 0x437   : > { %1168 = vmatprep.subr.mxu0 %v1256_v0 }
 0x438   : > { %v1227_v4 = vpop.eup %1226 }
 0x439   : > { %v560_v5 = vmul.f32 %v1227_v4, %v1221_v55 }
 0x43b   : > { %1161 = vmatmul.mubr.msk.f32.vlgmr.msra.gmra.mrb[2].mxu0 %vm300_vm1, %v560_v5 }
 0x43c   : > { %v1229_v7 = vpop.eup %1228  ;;  %1169 = vmatpush3.msra.mxu0 %v730_v6  ;;  %1170 = vmatprep.mubr.msk.f32.mxu0 %vm1257_vm0, %v1256_v0 }
 0x43d   : > { %v728_v8 = vmul.f32 %v1229_v7, %v1223_v57  ;;  %1178 = vmatprep.subr.mxu0 %v1256_v0 }
 0x43f   : > { %1171 = vmatmul.mubr.msk.f32.vlgmr.msra.gmra.mrb[4].mxu0 %vm300_vm1, %v728_v8 }
 0x440   : > { %1180 = vmatprep.mubr.msk.f32.mxu0 %vm1257_vm0, %v1256_v0 }
 0x462   : > { %v893_v9 = vpop.xlane.xlu1 %892 }
 0x463   : > { %1230 = vrcp.f32 %v893_v9 }
 0x466   : > { %v897_v10 = vpop.permute.xlu1 %896 }
 0x467   : > { %1179 = vmatpush3.msra.mxu0 %v897_v10 }
 0x46d   : > { %v1231_v11 = vpop.eup %1230 }
 0x46e   : > { %v895_v12 = vmul.f32 %v1231_v11, %v1225_v62 }
 0x470   : > { %1181 = vmatmul.mubr.msk.f32.vlgmr.msra.gmra.mrb[6].mxu0 %vm300_vm1, %v895_v12 }
 0x50e   : > { %v634_v13 = vpop.f32.mrb[2].mxu0 }
 0x50f   : > { %973 = vrot.lane.b32.xlu0 %v634_v13, %s1262_s9  ;;  %v1162_v14 = vpop.f32.mrb[3].mxu0 }
 0x512   : > { %v801_v15 = vpop.f32.mrb[4].mxu0 }
 0x513   : > { %977 = vrot.lane.b32.xlu1 %v801_v15, %s1263_s10  ;;  %v1172_v16 = vpop.f32.mrb[5].mxu0 }
 0x543   : > { %v968_v17 = vpop.f32.mrb[6].mxu0 }
 0x544   : > { %981 = vrot.lane.b32.xlu0 %v968_v17, %s1264_s11  ;;  %v1182_v0 = vpop.f32.mrb[7].mxu0 }
 0x581   : > { %v974_v18 = vpop.permute.xlu0 %973 }
 0x582   : > { %v984_v20 = vsel %vm300_vm1, %v1368_v32, %v974_v18 }
 0x585   : > { %v978_v19 = vpop.permute.xlu1 %977 }
 0x586   : > { %v986_v21 = vsel %vm985_vm4, %v984_v20, %v978_v19 }
 0x5b6   : > { %v982_v22 = vpop.permute.xlu0 %981 }
 0x5b7   : > { %v988_v23 = vsel %vm987_vm5, %v986_v21, %v982_v22 }
 0x5b8   : > { %990 = vst.msk [vmem:[%s293_s14] sm:$0xff] %vm989_vm6, %v988_v23 }
 0x5b9 PF: > { %s14_s17 = sadd.s32 1, %s1254_s17   ;;  %s1417_s15 = smov %s1250_s16 }
 0x5ba   : > { %p11_p5 = scmp.ge.s32.totalorder %s14_s17, 4   ;;  %s1418_s16 = smov %s1420_s18 }
 0x5bc   :  { %13 = sbr.rel (!%p11_p5) target bundleno = 2 (0x2), region = 75 }

// kernel: decoder_forward.24
= control target key start
LH: loop header
LB: loop body
LE: loop exit
PB: predicated region body
PF: predicated region fallthrough
CT: control target
= control target key end

     0   :  { %vm30_vm0 = vcmask 261120   ;;  %vm197_vm5 = vcmask 523264   ;;  %s501_s0 = inlined_call_operand.vmem [shape: f32[16,32], index: 0, kind: input, shape index: {}]   ;;  %s502_s3 = inlined_call_operand.vmem [shape: f32[32,64], index: 3, kind: input, shape index: {}]   ;;  %s503_s5 = inlined_call_operand.vmem [shape: f32[64,32], index: 5, kind: input, shape index: {}]   ;;  %s504_s1 = inlined_call_operand.vmem [shape: f32[1,32], index: 1, kind: input, shape index: {}]   ;;  %s505_s2 = inlined_call_operand.vmem [shape: f32[1,32], index: 2, kind: input, shape index: {}]   ;;  %s506_s4 = inlined_call_operand.vmem [shape: f32[1,64], index: 4, kind: input, shape index: {}]   ;;  %s507_s6 = inlined_call_operand.vmem [shape: f32[1,32], index: 6, kind: input, shape index: {}]   ;;  %s508_s7 = inlined_call_operand.vmem [shape: f32[16,32], index: 7, kind: output, shape index: {}]  }
   0x1   :  { %v416_v0 = vld [vmem:[%s501_s0] sm:$0xff]  ;;  %v421_v1 = vld [vmem:[%s501_s0 + $0x8] sm:$0xff]  ;;  %v90_v16 = vld [vmem:[%s502_s3 + $0x10] sm:$0xff] }
   0x2   :  { %v31_v2 = vsel %vm30_vm0, %v416_v0, 0.0  ;;  %v34_v3 = vsel %vm30_vm0, %v421_v1, 0.0  ;;  %v88_v14 = vld [vmem:[%s502_s3] sm:$0xff]  ;;  %v89_v15 = vld [vmem:[%s502_s3 + $0x8] sm:$0xff]  ;;  %v91_v18 = vld [vmem:[%s502_s3 + $0x18] sm:$0xff] }
   0x3   :  { %32 = vadd.xlane.f32.xlu0 %v31_v2  ;;  %v341_v17 = vpack.c.bf16 %v89_v15, %v88_v14  ;;  %v345_v19 = vpack.c.bf16 %v91_v18, %v90_v16  ;;  %v182_v20 = vld [vmem:[%s503_s5] sm:$0xff]  ;;  %v183_v21 = vld [vmem:[%s503_s5 + $0x8] sm:$0xff]  ;;  %v184_v22 = vld [vmem:[%s503_s5 + $0x10] sm:$0xff] }
   0x4   :  { %v349_v23 = vpack.c.bf16 %v183_v21, %v182_v20  ;;  %v185_v24 = vld [vmem:[%s503_s5 + $0x18] sm:$0xff]  ;;  %v186_v26 = vld [vmem:[%s503_s5 + $0x20] sm:$0xff]  ;;  %v187_v27 = vld [vmem:[%s503_s5 + $0x28] sm:$0xff] }
   0x5   :  { %342 = vmatprep.subr.bf16.mxu0 %v341_v17  ;;  %v353_v25 = vpack.c.bf16 %v185_v24, %v184_v22  ;;  %v357_v28 = vpack.c.bf16 %v187_v27, %v186_v26  ;;  %v287_v45 = vld [vmem:[%s504_s1] ss:$0 sm:$0xff]  ;;  %v188_v55 = vld [vmem:[%s503_s5 + $0x30] sm:$0xff]  ;;  %v189_v56 = vld [vmem:[%s503_s5 + $0x38] sm:$0xff] }
   0x6   :  { %344 = vmatpush3.bf16.msra.mxu0 %v341_v17  ;;  %350 = vmatprep.subr.bf16.mxu1 %v349_v23  ;;  %v288_v48 = vld [vmem:[%s505_s2] ss:$0 sm:$0xff]  ;;  %v361_v57 = vpack.c.bf16 %v189_v56, %v188_v55 }
   0x7   :  { %35 = vadd.xlane.f32.xlu0 %v34_v3  ;;  %346 = vmatprep.subr.bf16.mxu0 %v345_v19  ;;  %v289_v58 = vld [vmem:[%s506_s4] ss:$0 sm:$0xff] }
   0x8   :  { %352 = vmatpush3.bf16.msra.mxu1 %v349_v23  ;;  %v292_v3 = vld [vmem:[%s507_s6] ss:$0 sm:$0xff] }
   0x9   :  { %354 = vmatprep.subr.bf16.mxu1 %v353_v25 }
   0xa   :  { %348 = vmatpush3.bf16.msra.mxu0 %v345_v19 }
   0xc   :  { %356 = vmatpush3.bf16.msra.mxu1 %v353_v25 }
   0xd   :  { %358 = vmatprep.subr.bf16.mxu1 %v357_v28 }
  0x10   :  { %360 = vmatpush3.bf16.msra.mxu1 %v357_v28 }
  0x11   :  { %362 = vmatprep.subr.bf16.mxu1 %v361_v57 }
  0x14   :  { %364 = vmatpush3.bf16.msra.mxu1 %v361_v57 }
  0x90   :  { %v33_v4 = vpop.xlane.xlu0 %32 }
  0x91   :  { %v38_v5 = vmul.f32 0.03125, %v33_v4 }
  0x93   :  { %v428_v6 = vsub.f32 %v416_v0, %v38_v5 }
  0x94   :  { %v36_v7 = vpop.xlane.xlu0 %35 }
  0x95   :  { %v39_v8 = vmul.f32 0.03125, %v36_v7  ;;  %v42_v9 = vmul.f32 %v428_v6, %v428_v6  ;;  %v72_v46 = vmul.f32 %v287_v45, %v428_v6 }
  0x97   :  { %v433_v10 = vsub.f32 %v421_v1, %v39_v8  ;;  %v44_v11 = vsel %vm30_vm0, %v42_v9, 0.0 }
  0x98   :  { %45 = vadd.xlane.f32.xlu1 %v44_v11 }
  0x99   :  { %v43_v12 = vmul.f32 %v433_v10, %v433_v10  ;;  %v73_v50 = vmul.f32 %v287_v45, %v433_v10 }
  0x9b   :  { %v47_v13 = vsel %vm30_vm0, %v43_v12, 0.0 }
  0x9c   :  { %48 = vadd.xlane.f32.xlu1 %v47_v13 }
 0x125   :  { %v46_v29 = vpop.xlane.xlu1 %45 }
 0x126   :  { %v50_v30 = vmul.f32 0.032258064, %v46_v29 }
 0x128   :  { %365 = vrsqrt.f32 %v50_v30  ;;  %vm54_vm1 = vcmp.eq.f32.partialorder %v50_v30, inf  ;;  %v57_v35 = vand.u32 2147483648, %v50_v30  ;;  %vm56_vm2 = vcmp.eq.f32.partialorder %v50_v30, 0.0 }
 0x129   :  { %v49_v31 = vpop.xlane.xlu1 %48 }
 0x12a   :  { %v51_v32 = vmul.f32 0.032258064, %v49_v31 }
 0x12c   :  { %367 = vrsqrt.f32 %v51_v32  ;;  %vm61_vm3 = vcmp.eq.f32.partialorder %v51_v32, inf  ;;  %v64_v41 = vand.u32 2147483648, %v51_v32  ;;  %vm63_vm4 = vcmp.eq.f32.partialorder %v51_v32, 0.0 }
 0x132   :  { %v366_v33 = vpop.eup %365 }
 0x133   :  { %v53_v34 = vmul.f32 %v366_v33, %v50_v30 }
 0x135   :  { %v55_v36 = vsel %vm54_vm1, %v50_v30, %v53_v34 }
 0x136   :  { %v368_v37 = vpop.eup %367  ;;  %v58_v38 = vsel %vm56_vm2, %v57_v35, %v55_v36 }
 0x137   :  { %v60_v39 = vmul.f32 %v368_v37, %v51_v32  ;;  %v74_v40 = vadd.f32 1e-06, %v58_v38 }
 0x139   :  { %v62_v42 = vsel %vm61_vm3, %v51_v32, %v60_v39  ;;  %369 = vrcp.f32 %v74_v40 }
 0x13a   :  { %v65_v43 = vsel %vm63_vm4, %v64_v41, %v62_v42 }
 0x13b   :  { %v75_v44 = vadd.f32 1e-06, %v65_v43 }
 0x13d   :  { %371 = vrcp.f32 %v75_v44 }
 0x143   :  { %v370_v47 = vpop.eup %369 }
 0x144   :  { %v78_v49 = vmul.f32 %v370_v47, %v72_v46 }
 0x146   :  { %v86_v51 = vadd.f32 %v288_v48, %v78_v49 }
 0x147   :  { %v372_v52 = vpop.eup %371 }
 0x148   :  { %v79_v53 = vmul.f32 %v372_v52, %v73_v50  ;;  %319 = vmatprep.mubr.msk.f32.mxu0 %vm30_vm0, %v86_v51 }
 0x14a   :  { %v87_v54 = vadd.f32 %v288_v48, %v79_v53 }
 0x14c   :  { %320 = vmatmul.mubr.msk.f32.vlgmr.msra.gmra.mrb[0].mxu0 %vm30_vm0, %v87_v54 }
 0x21f   :  { %v321_v59 = vpop.f32.mrb[0].mxu0 }
 0x220   :  { %v177_v60 = vadd.f32 %v321_v59, %v289_v58  ;;  %v171_v61 = vpop.f32.mrb[1].mxu0 }
 0x221   :  { %v172_v62 = vadd.f32 %v289_v58, %v171_v61 }
 0x222   :  { %v181_v2 = vmax.f32 %v177_v60, 0.0 }
 0x223   :  { %v180_v63 = vmax.f32 %v172_v62, 0.0 }
 0x225   :  { %338 = vmatprep.mubr.msk.f32.mxu1 %vm197_vm5, %v180_v63 }
 0x226   :  { %339 = vmatmul.mubr.msk.f32.vlgmr.msra.gmra.mrb[0].mxu1 %vm197_vm5, %v181_v2 }
 0x2f9   :  { %v340_v4 = vpop.f32.mrb[0].mxu1 }
 0x2fa   :  { %v276_v5 = vadd.f32 %v340_v4, %v292_v3  ;;  %v270_v6 = vpop.f32.mrb[1].mxu1 }
 0x2fb   :  { %v271_v7 = vadd.f32 %v292_v3, %v270_v6 }
 0x2fc   :  { %v280_v8 = vadd.f32 %v276_v5, %v421_v1 }
 0x2fd   :  { %v279_v9 = vadd.f32 %v271_v7, %v416_v0 }
 0x2fe   :  { %282 = vst.msk [vmem:[%s508_s7 + $0x8] sm:$0xff] %vm30_vm0, %v280_v8 }
 0x2ff   :  { %281 = vst.msk [vmem:[%s508_s7] sm:$0xff] %vm30_vm0, %v279_v9 }

// kernel: decoder_forward.33
= control target key start
LH: loop header
LB: loop body
LE: loop exit
PB: predicated region body
PF: predicated region fallthrough
CT: control target
= control target key end

     0   :  { %vm19_vm0 = vcmask 261120   ;;  %s185_s0 = inlined_call_operand.vmem [shape: f32[16,32], index: 0, kind: input, shape index: {}]   ;;  %s186_s1 = inlined_call_operand.vmem [shape: f32[1,32], index: 1, kind: input, shape index: {}]   ;;  %s187_s2 = inlined_call_operand.vmem [shape: f32[1,32], index: 2, kind: input, shape index: {}]   ;;  %s188_s3 = inlined_call_operand.hbm [shape: f32[16,32], index: 3, kind: output, shape index: {}]  }
   0x1   :  { %v15_v0 = vld [vmem:[%s185_s0] sm:$0xff]  ;;  %v16_v1 = vld [vmem:[%s185_s0 + $0x8] sm:$0xff] }
   0x2   :  { %v20_v2 = vsel %vm19_vm0, %v15_v0, 0.0 }
   0x3   :  { %8 = vsyncpa [#allocation3], 0  ;;  %21 = vadd.xlane.f32.xlu0 %v20_v2  ;;  %v23_v3 = vsel %vm19_vm0, %v16_v1, 0.0  ;;  %v95_v30 = vld [vmem:[%s186_s1] ss:$0 sm:$0xff]  ;;  %s132_s19 = smov [#allocation2]  }
   0x4   :  { %v96_v33 = vld [vmem:[%s187_s2] ss:$0 sm:$0xff]  ;;  %s84_s20 = sshll.u32 %s132_s19, 4  ;;  %s85_s20 = int_to_ptr.vmem [resolvable:$true] %s84_s20 }
   0x5   :  { %s108_s1 = scalar_lea.vmem %s85_s20, 256  ;;  %p113_p1 = scmp.lt.s32.totalorder %s85_s20, %s85_s20 }
   0x6   :  { %p109_p0 = scmp.ne.s32.totalorder %s85_s20, %s108_s1  ;;  %p114_p2 = scmp.lt.s32.totalorder %s108_s1, %s108_s1 }
   0x7   :  { %24 = vadd.xlane.f32.xlu0 %v23_v3 }
   0x8   :  { %p115_p3 = por %p114_p2, %p113_p1 }
   0xa   :  { %p116_p4 = pnand %p115_p3, %p109_p0 }
  0x90   :  { %v22_v4 = vpop.xlane.xlu0 %21 }
  0x91   :  { %v27_v5 = vmul.f32 0.03125, %v22_v4 }
  0x93   :  { %v29_v6 = vsub.f32 %v15_v0, %v27_v5 }
  0x94   :  { %v25_v7 = vpop.xlane.xlu0 %24 }
  0x95   :  { %v28_v8 = vmul.f32 0.03125, %v25_v7  ;;  %v31_v9 = vmul.f32 %v29_v6, %v29_v6  ;;  %v61_v31 = vmul.f32 %v95_v30, %v29_v6 }
  0x97   :  { %v30_v10 = vsub.f32 %v16_v1, %v28_v8  ;;  %v33_v11 = vsel %vm19_vm0, %v31_v9, 0.0 }
  0x98   :  { %34 = vadd.xlane.f32.xlu1 %v33_v11 }
  0x99   :  { %v32_v12 = vmul.f32 %v30_v10, %v30_v10  ;;  %v62_v35 = vmul.f32 %v95_v30, %v30_v10 }
  0x9b   :  { %v36_v13 = vsel %vm19_vm0, %v32_v12, 0.0 }
  0x9c   :  { %37 = vadd.xlane.f32.xlu1 %v36_v13 }
 0x125   :  { %v35_v14 = vpop.xlane.xlu1 %34 }
 0x126   :  { %v39_v15 = vmul.f32 0.032258064, %v35_v14 }
 0x128   :  { %100 = vrsqrt.f32 %v39_v15  ;;  %vm43_vm1 = vcmp.eq.f32.partialorder %v39_v15, inf  ;;  %v46_v20 = vand.u32 2147483648, %v39_v15  ;;  %vm45_vm2 = vcmp.eq.f32.partialorder %v39_v15, 0.0 }
 0x129   :  { %v38_v16 = vpop.xlane.xlu1 %37 }
 0x12a   :  { %v40_v17 = vmul.f32 0.032258064, %v38_v16 }
 0x12c   :  { %102 = vrsqrt.f32 %v40_v17  ;;  %vm50_vm3 = vcmp.eq.f32.partialorder %v40_v17, inf  ;;  %v53_v26 = vand.u32 2147483648, %v40_v17  ;;  %vm52_vm4 = vcmp.eq.f32.partialorder %v40_v17, 0.0 }
 0x132   :  { %v101_v18 = vpop.eup %100 }
 0x133   :  { %v42_v19 = vmul.f32 %v101_v18, %v39_v15 }
 0x135   :  { %v44_v21 = vsel %vm43_vm1, %v39_v15, %v42_v19 }
 0x136   :  { %v103_v22 = vpop.eup %102  ;;  %v47_v23 = vsel %vm45_vm2, %v46_v20, %v44_v21 }
 0x137   :  { %v63_v24 = vadd.f32 1e-06, %v47_v23  ;;  %v49_v25 = vmul.f32 %v103_v22, %v40_v17 }
 0x139   :  { %104 = vrcp.f32 %v63_v24  ;;  %v51_v27 = vsel %vm50_vm3, %v40_v17, %v49_v25 }
 0x13a   :  { %v54_v28 = vsel %vm52_vm4, %v53_v26, %v51_v27 }
 0x13b   :  { %v64_v29 = vadd.f32 1e-06, %v54_v28 }
 0x13d   :  { %106 = vrcp.f32 %v64_v29 }
 0x143   :  { %v105_v32 = vpop.eup %104 }
 0x144   :  { %v67_v34 = vmul.f32 %v105_v32, %v61_v31 }
 0x146   :  { %v75_v36 = vadd.f32 %v96_v33, %v67_v34 }
 0x147   :  { %v107_v37 = vpop.eup %106 }
 0x148   :  { %v68_v38 = vmul.f32 %v107_v37, %v62_v35  ;;  %77 = vst.msk [vmem:[#allocation2] sm:$0xff] %vm19_vm0, %v75_v36 }
 0x14a   :  { %v76_v39 = vadd.f32 %v96_v33, %v68_v38 }
 0x14c   :  { %78 = vst.msk [vmem:[#allocation2 + $0x8] sm:$0xff] %vm19_vm0, %v76_v39 }
 0x14d   :  { %119 = shalt.err (!%p116_p4)
}
 0x14e   :  { %s120_s22 = scalar_lea.hbm %s188_s3, 256 }
 0x14f   :  { %p121_p5 = scmp.ne.s32.totalorder %s188_s3, %s120_s22  ;;  %p124_p6 = scmp.lt.u32.totalorder %s120_s22, %s188_s3 }
 0x151   :  { %p126_p7 = pnand %p124_p6, %p121_p5 }
 0x153   :  { %129 = shalt.err (!%p126_p7)
}
 0x154   :  { %s133_s27 = smov 128   ;;  %s134_s28 = smov 8  }
 0x155   :  { %90 = dma.vmem_to_hbm [thread:$0]  %s85_s20, 256, %s188_s3, [#allocation3], %s133_s27, %s133_s27, %s134_s28  }
 0x156   :  { %130 = dma.done.wait [#allocation3], 256  }
 0x157   :  { %131 = vsyncadd [#allocation3], 4294967040 }
 0x158   :  { %94 = vsyncpa [#allocation3], 1 }

</bundles_post_ra>
